<compile_context>
chip_gen: v7x
topology: tpu7x:2x2x1
jax: 0.10.0
libtpu: 0.0.40
codegen_flags: <defaults>
</compile_context>

<pallas_src>
import functools

import jax
import jax.numpy as jnp
from jax.experimental import pallas as pl
from jax.experimental.pallas import tpu as pltpu

_LANE = 128
_SUBLANE = 8


def _round_up(v, m):
    return ((v + m - 1) // m) * m


def _basis_params(num_basis, domain_range=(-1.0, 1.0)):
    """Centers / width of the triangular basis (python floats, baked as constants)."""
    dmin, dmax = domain_range
    if num_basis > 1:
        centers = tuple(float(dmin + (dmax - dmin) * k / (num_basis - 1))
                        for k in range(num_basis))
        width = (dmax - dmin) / (num_basis - 1)
    else:
        centers = (float(dmin),)
        width = 1.0
    return centers, float(width)


def _default_basis_dtype():
    """bf16 basis math only where the VPU has native bf16 (v6e / v7x)."""
    try:
        kind = jax.devices()[0].device_kind.lower()
    except Exception:
        kind = ""
    if ("v6" in kind) or ("v7" in kind) or ("7x" in kind):
        return jnp.bfloat16
    return jnp.float32


# ----------------------------------------------------------------------------
# Fused Pallas kernel: all KAN layers for one batch tile
# ----------------------------------------------------------------------------
def _fused_kan_kernel(*refs, num_layers, num_basis, in_dims, slab_cols,
                      inv_width, dmin, dmax, basis_dtype):
    """refs = (x_ref, w0, b0, w1, b1, ..., o_ref, slab0, slab1, ...).

    x_ref  : (TB, d_in0)                 f32   (feature-unpadded)
    wl_ref : (slab_cols_l, out_w_l)      bf16  (resident; rows ordered k*d_l + i)
    bl_ref : (1, out_w_l)                f32
    o_ref  : (TB, out_w_last)            f32   (out_w_last padded to 128 lanes)
    slab_l : (TB, slab_cols_l)           bf16  VMEM scratch (per-layer basis slab)
    """
    x_ref = refs[0]
    o_ref = refs[1 + 2 * num_layers]
    wb_refs = refs[1:1 + 2 * num_layers]
    slab_refs = refs[2 + 2 * num_layers:]

    h = x_ref[...].astype(jnp.float32)
    for layer in range(num_layers):
        w_ref = wb_refs[2 * layer]
        b_ref = wb_refs[2 * layer + 1]
        slab_ref = slab_refs[layer]
        d = in_dims[layer]
        kd = num_basis * d

        # Clamp + hoisted affine rescale in f32, then the per-center triangular
        # basis in basis_dtype (bf16 on v6e/v7x, f32 on v5e).
        t = ((jnp.clip(h, dmin, dmax) - dmin) * inv_width).astype(basis_dtype)
        for k in range(num_basis):
            part = jnp.maximum(1.0 - jnp.abs(t - float(k)), 0.0)
            # Pack back-to-back (column order k*d + i) -- no per-basis 128-padding.
            slab_ref[:, k * d:(k + 1) * d] = part.astype(jnp.bfloat16)
        if slab_cols[layer] > kd:
            # Zero the lane-padding columns: scratch is uninitialized and NaN*0
            # in the MXU would poison the accumulation even with zero weights.
            slab_ref[:, kd:] = jnp.zeros(
                (slab_ref.shape[0], slab_cols[layer] - kd), jnp.bfloat16)

        # One deep, well-filled MXU contraction per layer (bf16 in, f32 acc).
        h = jnp.dot(slab_ref[...], w_ref[...],
                    preferred_element_type=jnp.float32)
        h = h + b_ref[...]                       # (1, out_w) broadcasts over TB
        if layer < num_layers - 1:
            h = jnp.maximum(h, 0.0)              # ReLU, hidden never leaves VMEM

    o_ref[...] = h.astype(o_ref.dtype)


# ----------------------------------------------------------------------------
# Parameter preparation (done ONCE, hoisted out of the forward pass)
# ----------------------------------------------------------------------------
def prepare_kan_params(params):
    """Flatten / zero-pad / bf16-cast the per-layer weights once.

    Weight rows are ordered k*in_dim + i (matching the in-kernel slab columns);
    only the total row count is rounded up to 128.  Intermediate output widths
    stay unpadded; the final layer's output width is padded to 128 lanes.
    """
    prepared = []
    num_layers = len(params)
    num_basis = params[0][0].shape[0]
    prev_out = None
    for li, (w, b) in enumerate(params):
        K, d_in, d_out = w.shape
        assert K == num_basis, "all layers must share num_basis"
        if prev_out is not None:
            assert d_in == prev_out, "layer input dim mismatch"
        prev_out = d_out

        slab_cols = _round_up(K * d_in, _LANE)
        out_w = _round_up(d_out, _LANE) if li == num_layers - 1 else d_out

        w_flat = jnp.zeros((slab_cols, out_w), jnp.float32)
        w_flat = w_flat.at[:K * d_in, :d_out].set(
            w.astype(jnp.float32).reshape(K * d_in, d_out))
        b_p = jnp.zeros((1, out_w), jnp.float32)
        b_p = b_p.at[0, :d_out].set(b.astype(jnp.float32))

        prepared.append(dict(w=w_flat.astype(jnp.bfloat16), b=b_p,
                             d_in=d_in, d_out=d_out,
                             slab_cols=slab_cols, out_w=out_w, K=K))
    return prepared


# ----------------------------------------------------------------------------
# Wrapper: batch tiling + pallas_call
# ----------------------------------------------------------------------------
def kan_fused_forward(prepared, x2d, *, domain_range=(-1.0, 1.0),
                      max_batch_tile=1024, basis_dtype=None):
    """Run the whole multi-layer KAN on a (B, d_in) slab with one pallas_call."""
    B, d_in = x2d.shape
    num_layers = len(prepared)
    num_basis = prepared[0]["K"]
    assert d_in == prepared[0]["d_in"], "input feature dim mismatch"
    _, width = _basis_params(num_basis, domain_range)
    dmin, dmax = domain_range
    if basis_dtype is None:
        basis_dtype = _default_basis_dtype()

    # --- batch tiling: minimal padding, grid divides exactly, >=2 steps when
    # the batch allows (so v7x's two TensorCores both get work) ---------------
    B8 = _round_up(max(B, 1), _SUBLANE)
    n_tiles = (B8 + max_batch_tile - 1) // max_batch_tile
    if n_tiles == 1 and B8 >= 2 * _SUBLANE:
        n_tiles = 2
    tb = _round_up((B8 + n_tiles - 1) // n_tiles, _SUBLANE)
    b_pad = tb * n_tiles

    x_p = x2d.astype(jnp.float32)
    if b_pad != B:
        x_p = jnp.zeros((b_pad, d_in), jnp.float32).at[:B, :].set(x_p)

    # --- specs ----------------------------------------------------------------
    # x is feature-unpadded: last block dim equals the full array dim.
    in_specs = [pl.BlockSpec((tb, d_in), lambda i: (i, 0))]
    args = [x_p]
    for p in prepared:
        in_specs.append(pl.BlockSpec(p["w"].shape, lambda i: (0, 0)))   # resident
        in_specs.append(pl.BlockSpec(p["b"].shape, lambda i: (0, 0)))   # resident
        args += [p["w"], p["b"]]

    scratch = [pltpu.VMEM((tb, p["slab_cols"]), jnp.bfloat16) for p in prepared]

    out_w = prepared[-1]["out_w"]
    d_out = prepared[-1]["d_out"]
    in_dims = tuple(p["d_in"] for p in prepared)
    slab_cols = tuple(p["slab_cols"] for p in prepared)

    kernel = functools.partial(
        _fused_kan_kernel,
        num_layers=num_layers, num_basis=num_basis,
        in_dims=in_dims, slab_cols=slab_cols,
        inv_width=1.0 / width, dmin=float(dmin), dmax=float(dmax),
        basis_dtype=basis_dtype,
    )

    flops = int(sum(2 * b_pad * p["slab_cols"] * p["out_w"] for p in prepared))
    bytes_accessed = int(
        b_pad * d_in * 4
        + sum(p["w"].size * 2 + p["b"].size * 4 for p in prepared)
        + b_pad * out_w * 4)

    out = pl.pallas_call(
        kernel,
        out_shape=jax.ShapeDtypeStruct((b_pad, out_w), jnp.float32),
        grid=(n_tiles,),
        in_specs=in_specs,
        out_specs=pl.BlockSpec((tb, out_w), lambda i: (i, 0)),
        scratch_shapes=scratch,
        compiler_params=pltpu.CompilerParams(
            dimension_semantics=("parallel",),
            vmem_limit_bytes=32 * 1024 * 1024),
        cost_estimate=pl.CostEstimate(flops=flops, transcendentals=0,
                                      bytes_accessed=bytes_accessed),
    )(*args)

    return out[:B, :d_out]


# ----------------------------------------------------------------------------
# KAN model: parameter init + forward (mirrors the PyTorch module)
# ----------------------------------------------------------------------------
def init_kan_params(key, input_dim, hidden_dim, output_dim, num_basis=10,
                    layers=2):
    """Matches KAN.__init__: list of (weights, bias) per KANLayer."""
    dims = [input_dim] + [hidden_dim] * (layers - 1) + [output_dim]
    params = []
    for li in range(layers):
        key, sub = jax.random.split(key)
        in_d, out_d = dims[li], dims[li + 1]
        w = jax.random.uniform(sub, (num_basis, in_d, out_d),
                               minval=-0.1, maxval=0.1, dtype=jnp.float32)
        b = jnp.zeros((out_d,), jnp.float32)
        params.append((w, b))
    return params


def kan_forward(prepared, x_nchw, input_dim):
    """Forward pass matching KAN.forward.  x_nchw: (B, C, H, W)."""
    B = x_nchw.shape[0]
    x = x_nchw.reshape(B, -1)              # x.view(B, -1)
    if input_dim > 100:
        # TODO(synk): the reference module truncates x to 100 features here but
        # KANLayer still iterates input_dim features, which would crash in
        # PyTorch; only input_dim <= 100 is well-defined and reproduced.
        x = x[:, :100]
    return kan_fused_forward(prepared, x)


# ----------------------------------------------------------------------------
# References
# ----------------------------------------------------------------------------
def _ref_forward_f32(params, x_nchw, input_dim, domain_range=(-1.0, 1.0)):
    """Pure-f32 mirror of the PyTorch module (true reference semantics)."""
    x = x_nchw.reshape(x_nchw.shape[0], -1).astype(jnp.float32)
    if input_dim > 100:
        x = x[:, :100]
    dmin, dmax = domain_range
    n = len(params)
    for li, (w, b) in enumerate(params):
        K = w.shape[0]
        centers, width = _basis_params(K, domain_range)
        c = jnp.asarray(centers, jnp.float32)
        xc = jnp.clip(x, dmin, dmax)
        z = (xc[:, :, None] - c[None, None, :]) * (1.0 / width)
        basis = jnp.maximum(1.0 - jnp.abs(z), 0.0)            # (B, in, K)
        out = jnp.einsum('bik,kio->bo', basis, w.astype(jnp.float32),
                         preferred_element_type=jnp.float32) + b
        x = jnp.maximum(out, 0.0) if li < n - 1 else out
    return x


def _ref_forward_matched(params, x_nchw, input_dim, basis_dtype,
                         domain_range=(-1.0, 1.0)):
    """Mirror of the kernel's numerics (basis_dtype basis math, bf16 MXU
    operands, f32 accumulation) for a tight structural check."""
    x = x_nchw.reshape(x_nchw.shape[0], -1).astype(jnp.float32)
    if input_dim > 100:
        x = x[:, :100]
    dmin, dmax = domain_range
    n = len(params)
    for li, (w, b) in enumerate(params):
        K = w.shape[0]
        _, width = _basis_params(K, domain_range)
        t = ((jnp.clip(x, dmin, dmax) - dmin) * (1.0 / width)).astype(basis_dtype)
        ks = jnp.arange(K, dtype=jnp.float32).astype(basis_dtype)
        basis = jnp.maximum(1.0 - jnp.abs(t[:, None, :] - ks[None, :, None]), 0.0)
        out = jnp.einsum('bki,kio->bo', basis.astype(jnp.bfloat16),
                         w.astype(jnp.bfloat16),
                         preferred_element_type=jnp.float32) + b.astype(jnp.float32)
        x = jnp.maximum(out, 0.0) if li < n - 1 else out
    return x


# ----------------------------------------------------------------------------
if __name__ == "__main__":
    # Small shapes consistent with the module: a (B, 1, 10, 10) "image" so the
    # flattened input_dim = 100 (the >100 truncation branch stays inactive, as
    # required for the reference module to be well-defined). hidden_dim matches
    # the module's constant (64); B=16 exercises a 2-step batch grid.
    B, C, H, W = 16, 1, 10, 10
    input_dim = C * H * W          # 100
    hidden_dim = 64
    output_dim = 10
    num_basis = 10
    n_layers = 2

    key = jax.random.PRNGKey(0)
    key, xkey = jax.random.split(key)
    x = jax.random.normal(xkey, (B, C, H, W), dtype=jnp.float32)

    params = init_kan_params(key, input_dim, hidden_dim, output_dim,
                             num_basis=num_basis, layers=n_layers)
    prepared = prepare_kan_params(params)          # one-time weight prep (cached)

    out = kan_forward(prepared, x, input_dim)
    out = jax.block_until_ready(out)
    assert out.shape == (B, output_dim)

    basis_dtype = _default_basis_dtype()
    ref_match = _ref_forward_matched(params, x, input_dim, basis_dtype)
    ref_f32 = _ref_forward_f32(params, x, input_dim)

    # Tight check against a precision-matched reference (catches packing bugs).
    assert jnp.allclose(out, ref_match, atol=1e-2, rtol=1e-2), \
        "mismatch vs matched-precision reference"
    # Documented bf16 envelope vs the true f32 PyTorch semantics.
    assert jnp.allclose(out, ref_f32, atol=3e-2, rtol=3e-2), \
        "mismatch vs f32 reference beyond bf16 envelope"

    print("KERNEL_OK")
</pallas_src>

<mosaic_0001>
module attributes {stable_mosaic.version = 11 : i64} {
  func.func @_fused_kan_kernel(%arg0: i32, %arg1: memref<8x100xf32, #tpu.memory_space<vmem>>, %arg2: memref<1024x64xbf16, #tpu.memory_space<vmem>>, %arg3: memref<1x64xf32, #tpu.memory_space<vmem>>, %arg4: memref<640x128xbf16, #tpu.memory_space<vmem>>, %arg5: memref<1x128xf32, #tpu.memory_space<vmem>>, %arg6: memref<8x128xf32, #tpu.memory_space<vmem>>, %arg7: memref<8x1024xbf16, #tpu.memory_space<vmem>>, %arg8: memref<8x640xbf16, #tpu.memory_space<vmem>>) attributes {dimension_semantics = [#tpu.dimension_semantics<parallel>], iteration_bounds = array<i64: 2>, scalar_prefetch = 0 : i64, scratch_operands = 2 : i64, tpu.core_type = #tpu.core_type<tc>, window_params = [{transform_indices = @transform_0, window_bounds = array<i64: 8, 100>}, {pipeline_mode = #tpu.pipeline_mode<synchronous>, transform_indices = @transform_1, window_bounds = array<i64: 1024, 64>}, {pipeline_mode = #tpu.pipeline_mode<synchronous>, transform_indices = @transform_2, window_bounds = array<i64: 1, 64>}, {pipeline_mode = #tpu.pipeline_mode<synchronous>, transform_indices = @transform_3, window_bounds = array<i64: 640, 128>}, {pipeline_mode = #tpu.pipeline_mode<synchronous>, transform_indices = @transform_4, window_bounds = array<i64: 1, 128>}, {transform_indices = @transform_5, window_bounds = array<i64: 8, 128>}]} {
    %c0 = arith.constant 0 : index
    %c0_0 = arith.constant 0 : index
    %0 = vector.load %arg1[%c0, %c0_0] : memref<8x100xf32, #tpu.memory_space<vmem>>, vector<8x100xf32>
    %cst = arith.constant -1.000000e+00 : f32
    %cst_1 = arith.constant 1.000000e+00 : f32
    %1 = vector.broadcast %cst : f32 to vector<8x100xf32>
    %2 = arith.maximumf %1, %0 : vector<8x100xf32>
    %3 = vector.broadcast %cst_1 : f32 to vector<8x100xf32>
    %4 = arith.minimumf %3, %2 : vector<8x100xf32>
    %cst_2 = arith.constant -1.000000e+00 : f32
    %5 = vector.broadcast %cst_2 : f32 to vector<8x100xf32>
    %6 = arith.subf %4, %5 : vector<8x100xf32>
    %cst_3 = arith.constant 4.500000e+00 : f32
    %7 = vector.broadcast %cst_3 : f32 to vector<8x100xf32>
    %8 = arith.mulf %6, %7 : vector<8x100xf32>
    %cst_4 = arith.constant 0.000000e+00 : f32
    %9 = vector.broadcast %cst_4 : f32 to vector<8x100xf32>
    %10 = arith.subf %8, %9 : vector<8x100xf32>
    %11 = math.absf %10 : vector<8x100xf32>
    %cst_5 = arith.constant 1.000000e+00 : f32
    %12 = vector.broadcast %cst_5 : f32 to vector<8x100xf32>
    %13 = arith.subf %12, %11 : vector<8x100xf32>
    %cst_6 = arith.constant 0.000000e+00 : f32
    %14 = vector.broadcast %cst_6 : f32 to vector<8x100xf32>
    %15 = arith.maximumf %13, %14 : vector<8x100xf32>
    %16 = arith.truncf %15 : vector<8x100xf32> to vector<8x100xbf16>
    %c0_7 = arith.constant 0 : index
    %c0_8 = arith.constant 0 : index
    %17 = vector.load %arg7[%c0_7, %c0_8] : memref<8x1024xbf16, #tpu.memory_space<vmem>>, vector<8x100xbf16>
    tpu.vector_store %arg7[%c0_7, %c0_8], %16 {strides = array<i32>} : memref<8x1024xbf16, #tpu.memory_space<vmem>>, vector<8x100xbf16>,
    %cst_9 = arith.constant 1.000000e+00 : f32
    %18 = vector.broadcast %cst_9 : f32 to vector<8x100xf32>
    %19 = arith.subf %8, %18 : vector<8x100xf32>
    %20 = math.absf %19 : vector<8x100xf32>
    %cst_10 = arith.constant 1.000000e+00 : f32
    %21 = vector.broadcast %cst_10 : f32 to vector<8x100xf32>
    %22 = arith.subf %21, %20 : vector<8x100xf32>
    %cst_11 = arith.constant 0.000000e+00 : f32
    %23 = vector.broadcast %cst_11 : f32 to vector<8x100xf32>
    %24 = arith.maximumf %22, %23 : vector<8x100xf32>
    %25 = arith.truncf %24 : vector<8x100xf32> to vector<8x100xbf16>
    %c0_12 = arith.constant 0 : index
    %c100 = arith.constant 100 : index
    %26 = vector.load %arg7[%c0_12, %c100] : memref<8x1024xbf16, #tpu.memory_space<vmem>>, vector<8x100xbf16>
    tpu.vector_store %arg7[%c0_12, %c100], %25 {strides = array<i32>} : memref<8x1024xbf16, #tpu.memory_space<vmem>>, vector<8x100xbf16>,
    %cst_13 = arith.constant 2.000000e+00 : f32
    %27 = vector.broadcast %cst_13 : f32 to vector<8x100xf32>
    %28 = arith.subf %8, %27 : vector<8x100xf32>
    %29 = math.absf %28 : vector<8x100xf32>
    %cst_14 = arith.constant 1.000000e+00 : f32
    %30 = vector.broadcast %cst_14 : f32 to vector<8x100xf32>
    %31 = arith.subf %30, %29 : vector<8x100xf32>
    %cst_15 = arith.constant 0.000000e+00 : f32
    %32 = vector.broadcast %cst_15 : f32 to vector<8x100xf32>
    %33 = arith.maximumf %31, %32 : vector<8x100xf32>
    %34 = arith.truncf %33 : vector<8x100xf32> to vector<8x100xbf16>
    %c0_16 = arith.constant 0 : index
    %c200 = arith.constant 200 : index
    %35 = vector.load %arg7[%c0_16, %c200] : memref<8x1024xbf16, #tpu.memory_space<vmem>>, vector<8x100xbf16>
    tpu.vector_store %arg7[%c0_16, %c200], %34 {strides = array<i32>} : memref<8x1024xbf16, #tpu.memory_space<vmem>>, vector<8x100xbf16>,
    %cst_17 = arith.constant 3.000000e+00 : f32
    %36 = vector.broadcast %cst_17 : f32 to vector<8x100xf32>
    %37 = arith.subf %8, %36 : vector<8x100xf32>
    %38 = math.absf %37 : vector<8x100xf32>
    %cst_18 = arith.constant 1.000000e+00 : f32
    %39 = vector.broadcast %cst_18 : f32 to vector<8x100xf32>
    %40 = arith.subf %39, %38 : vector<8x100xf32>
    %cst_19 = arith.constant 0.000000e+00 : f32
    %41 = vector.broadcast %cst_19 : f32 to vector<8x100xf32>
    %42 = arith.maximumf %40, %41 : vector<8x100xf32>
    %43 = arith.truncf %42 : vector<8x100xf32> to vector<8x100xbf16>
    %c0_20 = arith.constant 0 : index
    %c300 = arith.constant 300 : index
    %44 = vector.load %arg7[%c0_20, %c300] : memref<8x1024xbf16, #tpu.memory_space<vmem>>, vector<8x100xbf16>
    tpu.vector_store %arg7[%c0_20, %c300], %43 {strides = array<i32>} : memref<8x1024xbf16, #tpu.memory_space<vmem>>, vector<8x100xbf16>,
    %cst_21 = arith.constant 4.000000e+00 : f32
    %45 = vector.broadcast %cst_21 : f32 to vector<8x100xf32>
    %46 = arith.subf %8, %45 : vector<8x100xf32>
    %47 = math.absf %46 : vector<8x100xf32>
    %cst_22 = arith.constant 1.000000e+00 : f32
    %48 = vector.broadcast %cst_22 : f32 to vector<8x100xf32>
    %49 = arith.subf %48, %47 : vector<8x100xf32>
    %cst_23 = arith.constant 0.000000e+00 : f32
    %50 = vector.broadcast %cst_23 : f32 to vector<8x100xf32>
    %51 = arith.maximumf %49, %50 : vector<8x100xf32>
    %52 = arith.truncf %51 : vector<8x100xf32> to vector<8x100xbf16>
    %c0_24 = arith.constant 0 : index
    %c400 = arith.constant 400 : index
    %53 = vector.load %arg7[%c0_24, %c400] : memref<8x1024xbf16, #tpu.memory_space<vmem>>, vector<8x100xbf16>
    tpu.vector_store %arg7[%c0_24, %c400], %52 {strides = array<i32>} : memref<8x1024xbf16, #tpu.memory_space<vmem>>, vector<8x100xbf16>,
    %cst_25 = arith.constant 5.000000e+00 : f32
    %54 = vector.broadcast %cst_25 : f32 to vector<8x100xf32>
    %55 = arith.subf %8, %54 : vector<8x100xf32>
    %56 = math.absf %55 : vector<8x100xf32>
    %cst_26 = arith.constant 1.000000e+00 : f32
    %57 = vector.broadcast %cst_26 : f32 to vector<8x100xf32>
    %58 = arith.subf %57, %56 : vector<8x100xf32>
    %cst_27 = arith.constant 0.000000e+00 : f32
    %59 = vector.broadcast %cst_27 : f32 to vector<8x100xf32>
    %60 = arith.maximumf %58, %59 : vector<8x100xf32>
    %61 = arith.truncf %60 : vector<8x100xf32> to vector<8x100xbf16>
    %c0_28 = arith.constant 0 : index
    %c500 = arith.constant 500 : index
    %62 = vector.load %arg7[%c0_28, %c500] : memref<8x1024xbf16, #tpu.memory_space<vmem>>, vector<8x100xbf16>
    tpu.vector_store %arg7[%c0_28, %c500], %61 {strides = array<i32>} : memref<8x1024xbf16, #tpu.memory_space<vmem>>, vector<8x100xbf16>,
    %cst_29 = arith.constant 6.000000e+00 : f32
    %63 = vector.broadcast %cst_29 : f32 to vector<8x100xf32>
    %64 = arith.subf %8, %63 : vector<8x100xf32>
    %65 = math.absf %64 : vector<8x100xf32>
    %cst_30 = arith.constant 1.000000e+00 : f32
    %66 = vector.broadcast %cst_30 : f32 to vector<8x100xf32>
    %67 = arith.subf %66, %65 : vector<8x100xf32>
    %cst_31 = arith.constant 0.000000e+00 : f32
    %68 = vector.broadcast %cst_31 : f32 to vector<8x100xf32>
    %69 = arith.maximumf %67, %68 : vector<8x100xf32>
    %70 = arith.truncf %69 : vector<8x100xf32> to vector<8x100xbf16>
    %c0_32 = arith.constant 0 : index
    %c600 = arith.constant 600 : index
    %71 = vector.load %arg7[%c0_32, %c600] : memref<8x1024xbf16, #tpu.memory_space<vmem>>, vector<8x100xbf16>
    tpu.vector_store %arg7[%c0_32, %c600], %70 {strides = array<i32>} : memref<8x1024xbf16, #tpu.memory_space<vmem>>, vector<8x100xbf16>,
    %cst_33 = arith.constant 7.000000e+00 : f32
    %72 = vector.broadcast %cst_33 : f32 to vector<8x100xf32>
    %73 = arith.subf %8, %72 : vector<8x100xf32>
    %74 = math.absf %73 : vector<8x100xf32>
    %cst_34 = arith.constant 1.000000e+00 : f32
    %75 = vector.broadcast %cst_34 : f32 to vector<8x100xf32>
    %76 = arith.subf %75, %74 : vector<8x100xf32>
    %cst_35 = arith.constant 0.000000e+00 : f32
    %77 = vector.broadcast %cst_35 : f32 to vector<8x100xf32>
    %78 = arith.maximumf %76, %77 : vector<8x100xf32>
    %79 = arith.truncf %78 : vector<8x100xf32> to vector<8x100xbf16>
    %c0_36 = arith.constant 0 : index
    %c700 = arith.constant 700 : index
    %80 = vector.load %arg7[%c0_36, %c700] : memref<8x1024xbf16, #tpu.memory_space<vmem>>, vector<8x100xbf16>
    tpu.vector_store %arg7[%c0_36, %c700], %79 {strides = array<i32>} : memref<8x1024xbf16, #tpu.memory_space<vmem>>, vector<8x100xbf16>,
    %cst_37 = arith.constant 8.000000e+00 : f32
    %81 = vector.broadcast %cst_37 : f32 to vector<8x100xf32>
    %82 = arith.subf %8, %81 : vector<8x100xf32>
    %83 = math.absf %82 : vector<8x100xf32>
    %cst_38 = arith.constant 1.000000e+00 : f32
    %84 = vector.broadcast %cst_38 : f32 to vector<8x100xf32>
    %85 = arith.subf %84, %83 : vector<8x100xf32>
    %cst_39 = arith.constant 0.000000e+00 : f32
    %86 = vector.broadcast %cst_39 : f32 to vector<8x100xf32>
    %87 = arith.maximumf %85, %86 : vector<8x100xf32>
    %88 = arith.truncf %87 : vector<8x100xf32> to vector<8x100xbf16>
    %c0_40 = arith.constant 0 : index
    %c800 = arith.constant 800 : index
    %89 = vector.load %arg7[%c0_40, %c800] : memref<8x1024xbf16, #tpu.memory_space<vmem>>, vector<8x100xbf16>
    tpu.vector_store %arg7[%c0_40, %c800], %88 {strides = array<i32>} : memref<8x1024xbf16, #tpu.memory_space<vmem>>, vector<8x100xbf16>,
    %cst_41 = arith.constant 9.000000e+00 : f32
    %90 = vector.broadcast %cst_41 : f32 to vector<8x100xf32>
    %91 = arith.subf %8, %90 : vector<8x100xf32>
    %92 = math.absf %91 : vector<8x100xf32>
    %cst_42 = arith.constant 1.000000e+00 : f32
    %93 = vector.broadcast %cst_42 : f32 to vector<8x100xf32>
    %94 = arith.subf %93, %92 : vector<8x100xf32>
    %cst_43 = arith.constant 0.000000e+00 : f32
    %95 = vector.broadcast %cst_43 : f32 to vector<8x100xf32>
    %96 = arith.maximumf %94, %95 : vector<8x100xf32>
    %97 = arith.truncf %96 : vector<8x100xf32> to vector<8x100xbf16>
    %c0_44 = arith.constant 0 : index
    %c900 = arith.constant 900 : index
    %98 = vector.load %arg7[%c0_44, %c900] : memref<8x1024xbf16, #tpu.memory_space<vmem>>, vector<8x100xbf16>
    tpu.vector_store %arg7[%c0_44, %c900], %97 {strides = array<i32>} : memref<8x1024xbf16, #tpu.memory_space<vmem>>, vector<8x100xbf16>,
    %cst_45 = arith.constant 0.000000e+00 : bf16
    %99 = vector.broadcast %cst_45 : bf16 to vector<8x24xbf16>
    %c0_46 = arith.constant 0 : index
    %c1000 = arith.constant 1000 : index
    %100 = vector.load %arg7[%c0_46, %c1000] : memref<8x1024xbf16, #tpu.memory_space<vmem>>, vector<8x24xbf16>
    tpu.vector_store %arg7[%c0_46, %c1000], %99 {strides = array<i32>} : memref<8x1024xbf16, #tpu.memory_space<vmem>>, vector<8x24xbf16>,
    %c0_47 = arith.constant 0 : index
    %c0_48 = arith.constant 0 : index
    %101 = vector.load %arg7[%c0_47, %c0_48] : memref<8x1024xbf16, #tpu.memory_space<vmem>>, vector<8x1024xbf16>
    %c0_49 = arith.constant 0 : index
    %c0_50 = arith.constant 0 : index
    %102 = vector.load %arg2[%c0_49, %c0_50] : memref<1024x64xbf16, #tpu.memory_space<vmem>>, vector<1024x64xbf16>
    %cst_51 = arith.constant dense<0.000000e+00> : vector<8x64xf32>
    %103 = tpu.matmul %101, %102, %cst_51 {dimension_numbers = #tpu.dot_dimension_numbers<[1], [0], [0], [1], [0, 0, 1, 1], [], []>} : vector<8x1024xbf16>, vector<1024x64xbf16>, vector<8x64xf32> -> vector<8x64xf32>
    %c0_52 = arith.constant 0 : index
    %c0_53 = arith.constant 0 : index
    %104 = vector.load %arg3[%c0_52, %c0_53] : memref<1x64xf32, #tpu.memory_space<vmem>>, vector<1x64xf32>
    %105 = vector.broadcast %104 : vector<1x64xf32> to vector<8x64xf32>
    %106 = arith.addf %103, %105 : vector<8x64xf32>
    %cst_54 = arith.constant 0.000000e+00 : f32
    %107 = vector.broadcast %cst_54 : f32 to vector<8x64xf32>
    %108 = arith.maximumf %106, %107 : vector<8x64xf32>
    %cst_55 = arith.constant -1.000000e+00 : f32
    %cst_56 = arith.constant 1.000000e+00 : f32
    %109 = vector.broadcast %cst_55 : f32 to vector<8x64xf32>
    %110 = arith.maximumf %109, %108 : vector<8x64xf32>
    %111 = vector.broadcast %cst_56 : f32 to vector<8x64xf32>
    %112 = arith.minimumf %111, %110 : vector<8x64xf32>
    %cst_57 = arith.constant -1.000000e+00 : f32
    %113 = vector.broadcast %cst_57 : f32 to vector<8x64xf32>
    %114 = arith.subf %112, %113 : vector<8x64xf32>
    %cst_58 = arith.constant 4.500000e+00 : f32
    %115 = vector.broadcast %cst_58 : f32 to vector<8x64xf32>
    %116 = arith.mulf %114, %115 : vector<8x64xf32>
    %cst_59 = arith.constant 0.000000e+00 : f32
    %117 = vector.broadcast %cst_59 : f32 to vector<8x64xf32>
    %118 = arith.subf %116, %117 : vector<8x64xf32>
    %119 = math.absf %118 : vector<8x64xf32>
    %cst_60 = arith.constant 1.000000e+00 : f32
    %120 = vector.broadcast %cst_60 : f32 to vector<8x64xf32>
    %121 = arith.subf %120, %119 : vector<8x64xf32>
    %cst_61 = arith.constant 0.000000e+00 : f32
    %122 = vector.broadcast %cst_61 : f32 to vector<8x64xf32>
    %123 = arith.maximumf %121, %122 : vector<8x64xf32>
    %124 = arith.truncf %123 : vector<8x64xf32> to vector<8x64xbf16>
    %c0_62 = arith.constant 0 : index
    %c0_63 = arith.constant 0 : index
    %125 = vector.load %arg8[%c0_62, %c0_63] : memref<8x640xbf16, #tpu.memory_space<vmem>>, vector<8x64xbf16>
    tpu.vector_store %arg8[%c0_62, %c0_63], %124 {strides = array<i32>} : memref<8x640xbf16, #tpu.memory_space<vmem>>, vector<8x64xbf16>,
    %cst_64 = arith.constant 1.000000e+00 : f32
    %126 = vector.broadcast %cst_64 : f32 to vector<8x64xf32>
    %127 = arith.subf %116, %126 : vector<8x64xf32>
    %128 = math.absf %127 : vector<8x64xf32>
    %cst_65 = arith.constant 1.000000e+00 : f32
    %129 = vector.broadcast %cst_65 : f32 to vector<8x64xf32>
    %130 = arith.subf %129, %128 : vector<8x64xf32>
    %cst_66 = arith.constant 0.000000e+00 : f32
    %131 = vector.broadcast %cst_66 : f32 to vector<8x64xf32>
    %132 = arith.maximumf %130, %131 : vector<8x64xf32>
    %133 = arith.truncf %132 : vector<8x64xf32> to vector<8x64xbf16>
    %c0_67 = arith.constant 0 : index
    %c64 = arith.constant 64 : index
    %134 = vector.load %arg8[%c0_67, %c64] : memref<8x640xbf16, #tpu.memory_space<vmem>>, vector<8x64xbf16>
    tpu.vector_store %arg8[%c0_67, %c64], %133 {strides = array<i32>} : memref<8x640xbf16, #tpu.memory_space<vmem>>, vector<8x64xbf16>,
    %cst_68 = arith.constant 2.000000e+00 : f32
    %135 = vector.broadcast %cst_68 : f32 to vector<8x64xf32>
    %136 = arith.subf %116, %135 : vector<8x64xf32>
    %137 = math.absf %136 : vector<8x64xf32>
    %cst_69 = arith.constant 1.000000e+00 : f32
    %138 = vector.broadcast %cst_69 : f32 to vector<8x64xf32>
    %139 = arith.subf %138, %137 : vector<8x64xf32>
    %cst_70 = arith.constant 0.000000e+00 : f32
    %140 = vector.broadcast %cst_70 : f32 to vector<8x64xf32>
    %141 = arith.maximumf %139, %140 : vector<8x64xf32>
    %142 = arith.truncf %141 : vector<8x64xf32> to vector<8x64xbf16>
    %c0_71 = arith.constant 0 : index
    %c128 = arith.constant 128 : index
    %143 = vector.load %arg8[%c0_71, %c128] : memref<8x640xbf16, #tpu.memory_space<vmem>>, vector<8x64xbf16>
    tpu.vector_store %arg8[%c0_71, %c128], %142 {strides = array<i32>} : memref<8x640xbf16, #tpu.memory_space<vmem>>, vector<8x64xbf16>,
    %cst_72 = arith.constant 3.000000e+00 : f32
    %144 = vector.broadcast %cst_72 : f32 to vector<8x64xf32>
    %145 = arith.subf %116, %144 : vector<8x64xf32>
    %146 = math.absf %145 : vector<8x64xf32>
    %cst_73 = arith.constant 1.000000e+00 : f32
    %147 = vector.broadcast %cst_73 : f32 to vector<8x64xf32>
    %148 = arith.subf %147, %146 : vector<8x64xf32>
    %cst_74 = arith.constant 0.000000e+00 : f32
    %149 = vector.broadcast %cst_74 : f32 to vector<8x64xf32>
    %150 = arith.maximumf %148, %149 : vector<8x64xf32>
    %151 = arith.truncf %150 : vector<8x64xf32> to vector<8x64xbf16>
    %c0_75 = arith.constant 0 : index
    %c192 = arith.constant 192 : index
    %152 = vector.load %arg8[%c0_75, %c192] : memref<8x640xbf16, #tpu.memory_space<vmem>>, vector<8x64xbf16>
    tpu.vector_store %arg8[%c0_75, %c192], %151 {strides = array<i32>} : memref<8x640xbf16, #tpu.memory_space<vmem>>, vector<8x64xbf16>,
    %cst_76 = arith.constant 4.000000e+00 : f32
    %153 = vector.broadcast %cst_76 : f32 to vector<8x64xf32>
    %154 = arith.subf %116, %153 : vector<8x64xf32>
    %155 = math.absf %154 : vector<8x64xf32>
    %cst_77 = arith.constant 1.000000e+00 : f32
    %156 = vector.broadcast %cst_77 : f32 to vector<8x64xf32>
    %157 = arith.subf %156, %155 : vector<8x64xf32>
    %cst_78 = arith.constant 0.000000e+00 : f32
    %158 = vector.broadcast %cst_78 : f32 to vector<8x64xf32>
    %159 = arith.maximumf %157, %158 : vector<8x64xf32>
    %160 = arith.truncf %159 : vector<8x64xf32> to vector<8x64xbf16>
    %c0_79 = arith.constant 0 : index
    %c256 = arith.constant 256 : index
    %161 = vector.load %arg8[%c0_79, %c256] : memref<8x640xbf16, #tpu.memory_space<vmem>>, vector<8x64xbf16>
    tpu.vector_store %arg8[%c0_79, %c256], %160 {strides = array<i32>} : memref<8x640xbf16, #tpu.memory_space<vmem>>, vector<8x64xbf16>,
    %cst_80 = arith.constant 5.000000e+00 : f32
    %162 = vector.broadcast %cst_80 : f32 to vector<8x64xf32>
    %163 = arith.subf %116, %162 : vector<8x64xf32>
    %164 = math.absf %163 : vector<8x64xf32>
    %cst_81 = arith.constant 1.000000e+00 : f32
    %165 = vector.broadcast %cst_81 : f32 to vector<8x64xf32>
    %166 = arith.subf %165, %164 : vector<8x64xf32>
    %cst_82 = arith.constant 0.000000e+00 : f32
    %167 = vector.broadcast %cst_82 : f32 to vector<8x64xf32>
    %168 = arith.maximumf %166, %167 : vector<8x64xf32>
    %169 = arith.truncf %168 : vector<8x64xf32> to vector<8x64xbf16>
    %c0_83 = arith.constant 0 : index
    %c320 = arith.constant 320 : index
    %170 = vector.load %arg8[%c0_83, %c320] : memref<8x640xbf16, #tpu.memory_space<vmem>>, vector<8x64xbf16>
    tpu.vector_store %arg8[%c0_83, %c320], %169 {strides = array<i32>} : memref<8x640xbf16, #tpu.memory_space<vmem>>, vector<8x64xbf16>,
    %cst_84 = arith.constant 6.000000e+00 : f32
    %171 = vector.broadcast %cst_84 : f32 to vector<8x64xf32>
    %172 = arith.subf %116, %171 : vector<8x64xf32>
    %173 = math.absf %172 : vector<8x64xf32>
    %cst_85 = arith.constant 1.000000e+00 : f32
    %174 = vector.broadcast %cst_85 : f32 to vector<8x64xf32>
    %175 = arith.subf %174, %173 : vector<8x64xf32>
    %cst_86 = arith.constant 0.000000e+00 : f32
    %176 = vector.broadcast %cst_86 : f32 to vector<8x64xf32>
    %177 = arith.maximumf %175, %176 : vector<8x64xf32>
    %178 = arith.truncf %177 : vector<8x64xf32> to vector<8x64xbf16>
    %c0_87 = arith.constant 0 : index
    %c384 = arith.constant 384 : index
    %179 = vector.load %arg8[%c0_87, %c384] : memref<8x640xbf16, #tpu.memory_space<vmem>>, vector<8x64xbf16>
    tpu.vector_store %arg8[%c0_87, %c384], %178 {strides = array<i32>} : memref<8x640xbf16, #tpu.memory_space<vmem>>, vector<8x64xbf16>,
    %cst_88 = arith.constant 7.000000e+00 : f32
    %180 = vector.broadcast %cst_88 : f32 to vector<8x64xf32>
    %181 = arith.subf %116, %180 : vector<8x64xf32>
    %182 = math.absf %181 : vector<8x64xf32>
    %cst_89 = arith.constant 1.000000e+00 : f32
    %183 = vector.broadcast %cst_89 : f32 to vector<8x64xf32>
    %184 = arith.subf %183, %182 : vector<8x64xf32>
    %cst_90 = arith.constant 0.000000e+00 : f32
    %185 = vector.broadcast %cst_90 : f32 to vector<8x64xf32>
    %186 = arith.maximumf %184, %185 : vector<8x64xf32>
    %187 = arith.truncf %186 : vector<8x64xf32> to vector<8x64xbf16>
    %c0_91 = arith.constant 0 : index
    %c448 = arith.constant 448 : index
    %188 = vector.load %arg8[%c0_91, %c448] : memref<8x640xbf16, #tpu.memory_space<vmem>>, vector<8x64xbf16>
    tpu.vector_store %arg8[%c0_91, %c448], %187 {strides = array<i32>} : memref<8x640xbf16, #tpu.memory_space<vmem>>, vector<8x64xbf16>,
    %cst_92 = arith.constant 8.000000e+00 : f32
    %189 = vector.broadcast %cst_92 : f32 to vector<8x64xf32>
    %190 = arith.subf %116, %189 : vector<8x64xf32>
    %191 = math.absf %190 : vector<8x64xf32>
    %cst_93 = arith.constant 1.000000e+00 : f32
    %192 = vector.broadcast %cst_93 : f32 to vector<8x64xf32>
    %193 = arith.subf %192, %191 : vector<8x64xf32>
    %cst_94 = arith.constant 0.000000e+00 : f32
    %194 = vector.broadcast %cst_94 : f32 to vector<8x64xf32>
    %195 = arith.maximumf %193, %194 : vector<8x64xf32>
    %196 = arith.truncf %195 : vector<8x64xf32> to vector<8x64xbf16>
    %c0_95 = arith.constant 0 : index
    %c512 = arith.constant 512 : index
    %197 = vector.load %arg8[%c0_95, %c512] : memref<8x640xbf16, #tpu.memory_space<vmem>>, vector<8x64xbf16>
    tpu.vector_store %arg8[%c0_95, %c512], %196 {strides = array<i32>} : memref<8x640xbf16, #tpu.memory_space<vmem>>, vector<8x64xbf16>,
    %cst_96 = arith.constant 9.000000e+00 : f32
    %198 = vector.broadcast %cst_96 : f32 to vector<8x64xf32>
    %199 = arith.subf %116, %198 : vector<8x64xf32>
    %200 = math.absf %199 : vector<8x64xf32>
    %cst_97 = arith.constant 1.000000e+00 : f32
    %201 = vector.broadcast %cst_97 : f32 to vector<8x64xf32>
    %202 = arith.subf %201, %200 : vector<8x64xf32>
    %cst_98 = arith.constant 0.000000e+00 : f32
    %203 = vector.broadcast %cst_98 : f32 to vector<8x64xf32>
    %204 = arith.maximumf %202, %203 : vector<8x64xf32>
    %205 = arith.truncf %204 : vector<8x64xf32> to vector<8x64xbf16>
    %c0_99 = arith.constant 0 : index
    %c576 = arith.constant 576 : index
    %206 = vector.load %arg8[%c0_99, %c576] : memref<8x640xbf16, #tpu.memory_space<vmem>>, vector<8x64xbf16>
    tpu.vector_store %arg8[%c0_99, %c576], %205 {strides = array<i32>} : memref<8x640xbf16, #tpu.memory_space<vmem>>, vector<8x64xbf16>,
    %c0_100 = arith.constant 0 : index
    %c0_101 = arith.constant 0 : index
    %207 = vector.load %arg8[%c0_100, %c0_101] : memref<8x640xbf16, #tpu.memory_space<vmem>>, vector<8x640xbf16>
    %c0_102 = arith.constant 0 : index
    %c0_103 = arith.constant 0 : index
    %208 = vector.load %arg4[%c0_102, %c0_103] : memref<640x128xbf16, #tpu.memory_space<vmem>>, vector<640x128xbf16>
    %cst_104 = arith.constant dense<0.000000e+00> : vector<8x128xf32>
    %209 = tpu.matmul %207, %208, %cst_104 {dimension_numbers = #tpu.dot_dimension_numbers<[1], [0], [0], [1], [0, 0, 1, 1], [], []>} : vector<8x640xbf16>, vector<640x128xbf16>, vector<8x128xf32> -> vector<8x128xf32>
    %c0_105 = arith.constant 0 : index
    %c0_106 = arith.constant 0 : index
    %210 = vector.load %arg5[%c0_105, %c0_106] : memref<1x128xf32, #tpu.memory_space<vmem>>, vector<1x128xf32>
    %211 = vector.broadcast %210 : vector<1x128xf32> to vector<8x128xf32>
    %212 = arith.addf %209, %211 : vector<8x128xf32>
    %c0_107 = arith.constant 0 : index
    %c0_108 = arith.constant 0 : index
    %213 = vector.load %arg6[%c0_107, %c0_108] : memref<8x128xf32, #tpu.memory_space<vmem>>, vector<8x128xf32>
    tpu.vector_store %arg6[%c0_107, %c0_108], %212 {strides = array<i32>} : memref<8x128xf32, #tpu.memory_space<vmem>>, vector<8x128xf32>,
    return
  }
  func.func @transform_0(%arg0: i32) -> (i32, i32) {
    %c0_i32 = arith.constant 0 : i32
    %c0_i32_0 = arith.constant 0 : i32
    return %arg0, %c0_i32 : i32, i32
  }
  func.func @transform_1(%arg0: i32) -> (i32, i32) {
    %c0_i32 = arith.constant 0 : i32
    %c0_i32_0 = arith.constant 0 : i32
    %c0_i32_1 = arith.constant 0 : i32
    return %c0_i32, %c0_i32_0 : i32, i32
  }
  func.func @transform_2(%arg0: i32) -> (i32, i32) {
    %c0_i32 = arith.constant 0 : i32
    %c0_i32_0 = arith.constant 0 : i32
    %c0_i32_1 = arith.constant 0 : i32
    return %c0_i32, %c0_i32_0 : i32, i32
  }
  func.func @transform_3(%arg0: i32) -> (i32, i32) {
    %c0_i32 = arith.constant 0 : i32
    %c0_i32_0 = arith.constant 0 : i32
    %c0_i32_1 = arith.constant 0 : i32
    return %c0_i32, %c0_i32_0 : i32, i32
  }
  func.func @transform_4(%arg0: i32) -> (i32, i32) {
    %c0_i32 = arith.constant 0 : i32
    %c0_i32_0 = arith.constant 0 : i32
    %c0_i32_1 = arith.constant 0 : i32
    return %c0_i32, %c0_i32_0 : i32, i32
  }
  func.func @transform_5(%arg0: i32) -> (i32, i32) {
    %c0_i32 = arith.constant 0 : i32
    %c0_i32_0 = arith.constant 0 : i32
    return %arg0, %c0_i32 : i32, i32
  }
}

</mosaic_0001>

<bundles_post_ra>
// kernel: tpu_custom_call.1
= control target key start
LH: loop header
LB: loop body
LE: loop exit
PB: predicated region body
PF: predicated region fallthrough
CT: control target
= control target key end

     0   :  { %10 = vsyncpa [#allocation5], 0  ;;  %s2784_s0 = inlined_call_operand.vmem [shape: f32[16,100], index: 0, kind: input, shape index: {}]   ;;  %s2785_s1 = inlined_call_operand.vmem [shape: bf16[1024,64], index: 1, kind: input, shape index: {}]   ;;  %s2786_s2 = inlined_call_operand.vmem [shape: f32[1,64], index: 2, kind: input, shape index: {}]   ;;  %s2787_s3 = inlined_call_operand.vmem [shape: bf16[640,128], index: 3, kind: input, shape index: {}]   ;;  %s2788_s4 = inlined_call_operand.vmem [shape: f32[1,128], index: 4, kind: input, shape index: {}]   ;;  %s2789_s5 = inlined_call_operand.hbm [shape: f32[16,128], index: 5, kind: output, shape index: {}]  }
   0x1   :  { %12 = vsyncpa [#allocation5 + $0x1], 0  ;;  %s2352_s18 = smov 0   ;;  %s2354_s19 = smov 0  }
   0x2   :  { %s2356_s20 = smov 0   ;;  %s2358_s21 = smov 0  }
   0x3 LB: > { %s2373_s22 = sadd.s32 4294967295, %s2306_s21   ;;  %s1735_s23 = sadd.s32 4294967294, %s2306_s21   ;;  %s2306_s21 = sphi %s2358_s21, %s2795_s21   ;;  %s2302_s20 = sphi %s2356_s20, %s2794_s20   ;;  %s2298_s19 = sphi %s2354_s19, %s2793_s19   ;;  %s2294_s18 = sphi %s2352_s18, %s2792_s18  }
   0x4   : > { %s2377_s24 = sadd.s32 1, %s2306_s21   ;;  %s135_s25 = sadd.s32 1, %s2302_s20 }
   0x5   : > { %s132_s26 = ssub.s32 %s2306_s21, %s2377_s24  ;;  %p145_p0 = scmp.ne.s32.totalorder %s2302_s20, %s2298_s19 }
   0x6   : > { %p133_p1 = scmp.eq.s32.totalorder %s132_s26, 0  ;;  %p146_p2 = scmp.eq.s32.totalorder %s2373_s22, 1 }
   0x7   : > { %p151_p3 = scmp.ne.s32.totalorder %s2298_s19, %s2294_s18  ;;  %p152_p4 = scmp.eq.s32.totalorder %s1735_s23, 1 }
   0x8   : > { %s2388_s27 = scalar_select %p133_p1, %s2302_s20, %s135_s25  }
   0x9   : > { %p2390_p5 = por %p146_p2, %p145_p0  ;;  %p2394_p6 = por %p152_p4, %p151_p3 }
   0xa   : > { %p1738_p7 = scmp.ge.s32.totalorder %s2306_s21, 1  ;;  %p189_p8 = scmp.lt.s32.totalorder %s2306_s21, 3 }
   0xc   : > { %p190_p9 = pnand %p1738_p7, %p189_p8 }
   0xd   : > { %p216_p10 = scmp.lt.s32.totalorder (!%p190_p9), %s2373_s22, 1  ;;  %v2127_v0 = vld [vmem:[%s2785_s1 + $0x40] sm:$0xff] (!%p190_p9)   ;;  %v2130_v3 = vld [vmem:[%s2785_s1 + $0x48] sm:$0xff] (!%p190_p9)   ;;  %v2134_v9 = vld [vmem:[%s2785_s1 + $0x50] sm:$0xff] (!%p190_p9)   ;;  %s2308_s10 = smov (!%p190_p9), 100   ;;  %vm230_vm0 = vcmask (!%p190_p9), 814080  }
   0xe   : > { %193 = sbr.rel (%p190_p9) target bundleno = 831 (0x33f), region = 40  ;;  %v2128_v1 = vld [vmem:[%s2785_s1] sm:$0xff] (!%p190_p9)   ;;  %1914 = vmatprep.subr.bf16.mxu0 (!%p190_p9), %v2127_v0  ;;  %v2132_v5 = vld [vmem:[%s2785_s1 + $0x8] sm:$0xff] (!%p190_p9)   ;;  %v2136_v12 = vld [vmem:[%s2785_s1 + $0x10] sm:$0xff] (!%p190_p9)   ;;  %s2309_s11 = smov (!%p190_p9), 44   ;;  %vm246_vm1 = vcmask (!%p190_p9), 1044256  }
   0xf   : > { %v2129_v2 = vld [vmem:[%s2785_s1 + $0xc0] sm:$0xff] (!%p190_p9)   ;;  %1915 = vmatpush3.bf16.msra.mxu0 (!%p190_p9), %v2128_v1  ;;  %v2133_v7 = vld [vmem:[%s2785_s1 + $0xc8] sm:$0xff] (!%p190_p9)   ;;  %v2137_v14 = vld [vmem:[%s2785_s1 + $0xd0] sm:$0xff] (!%p190_p9)   ;;  %s2310_s16 = smov (!%p190_p9), 72   ;;  %s2311_s17 = smov (!%p190_p9), 116   ;;  %vm247_vm2 = vcmask (!%p190_p9), 588804  }
  0x10   : > { %1936 = vmatprep.subr.bf16.mxu1 (!%p190_p9), %v2129_v2  ;;  %v2131_v4 = vld [vmem:[%s2785_s1 + $0x80] sm:$0xff] (!%p190_p9)   ;;  %1916 = vmatprep.subr.bf16.mxu0 (!%p190_p9), %v2130_v3  ;;  %v2135_v11 = vld [vmem:[%s2785_s1 + $0x88] sm:$0xff] (!%p190_p9)   ;;  %v2138_v15 = vld [vmem:[%s2785_s1 + $0x58] sm:$0xff] (!%p190_p9)   ;;  %s2314_s23 = smov (!%p190_p9), 60   ;;  %vm243_vm3 = vcmask (!%p190_p9), 818176   ;;  %vm264_vm5 = vcmask (!%p190_p9), 1044032  }
  0x11   : > { %1937 = vmatpush3.bf16.msra.mxu1 (!%p190_p9), %v2131_v4  ;;  %v2139_v34 = vld [vmem:[%s2785_s1 + $0x90] sm:$0xff] (!%p190_p9)   ;;  %v2140_v39 = vld [vmem:[%s2785_s1 + $0x18] sm:$0xff] (!%p190_p9)   ;;  %v2142_v50 = vld [vmem:[%s2785_s1 + $0x60] sm:$0xff] (!%p190_p9)   ;;  %vm265_vm6 = vcmask (!%p190_p9), 359428   ;;  %vm282_vm7 = vcmask (!%p190_p9), 1043808   ;;  %vm283_vm8 = vcmask (!%p190_p9), 130052  }
  0x12   : > { %1938 = vmatprep.subr.bf16.mxu1 (!%p190_p9), %v2133_v7  ;;  %v2141_v48 = vld [vmem:[%s2785_s1 + $0xd8] sm:$0xff] (!%p190_p9)   ;;  %v2144_v57 = vld [vmem:[%s2785_s1 + $0x20] sm:$0xff] (!%p190_p9)   ;;  %v2146_v3 = vld [vmem:[%s2785_s1 + $0x68] sm:$0xff] (!%p190_p9)   ;;  %vm261_vm9 = vcmask (!%p190_p9), 588800   ;;  %vm279_vm10 = vcmask (!%p190_p9), 359424   ;;  %vm313_vm12 = vcmask (!%p190_p9), 1044384  }
  0x13   : > { %1917 = vmatpush3.bf16.msra.mxu0 (!%p190_p9), %v2132_v5  ;;  %v2143_v55 = vld [vmem:[%s2785_s1 + $0x98] sm:$0xff] (!%p190_p9)   ;;  %v2145_v1 = vld [vmem:[%s2785_s1 + $0xe0] sm:$0xff] (!%p190_p9)   ;;  %vm248_vm4 = vmor (!%p190_p9), %vm247_vm2, %vm246_vm1  ;;  %vm314_vm13 = vcmask (!%p190_p9), 719876   ;;  %vm331_vm15 = vcmask (!%p190_p9), 1044160   ;;  %vm310_vm1 = vcmask (!%p190_p9), 949248   ;;  %vm297_vm2 = vcmask (!%p190_p9), 945280  }
  0x14   : > { %1918 = vmatprep.subr.bf16.mxu0 (!%p190_p9), %v2134_v9  ;;  %v2147_v4 = vld [vmem:[%s2785_s1 + $0xa0] sm:$0xff] (!%p190_p9)   ;;  %vm266_vm11 = vmor (!%p190_p9), %vm265_vm6, %vm264_vm5  ;;  %vm349_vm6 = vcmask (!%p190_p9), 1043936   ;;  %s2318_s30 = smov (!%p190_p9), 64   ;;  %s213_s8 = sand.u32 (!%p190_p9), 1, %s2298_s19  }
  0x15   : > { %s217_s9 = scalar_select %p216_p10, %s2373_s22, 1  ;;  %1939 = vmatpush3.bf16.msra.mxu1 %v2135_v11  ;;  %v2150_v11 = vld [vmem:[%s2785_s1 + $0x70] sm:$0xff]   ;;  %vm284_vm14 = vmor %vm283_vm8, %vm282_vm7  ;;  %vm350_vm7 = vcmask 261124   ;;  %vm367_vm8 = vcmask 1043712  }
  0x16   : > { %1940 = vmatprep.subr.bf16.mxu1 %v2137_v14  ;;  %v2152_v14 = vld [vmem:[%s2785_s1 + $0x30] sm:$0xff]  }
  0x17   : > { %s1740_s12 = sshll.u32 %s217_s9, 3  ;;  %1919 = vmatpush3.bf16.msra.mxu0 %v2136_v12  ;;  %v2151_v12 = vld [vmem:[%s2785_s1 + $0xa8] sm:$0xff]   ;;  %s1739_s9 = sshll.u32 %s213_s8, 3 }
  0x18   : > { %s219_s25 = scalar_lea.vmem %s2784_s0, %s1740_s12  ;;  %1920 = vmatprep.subr.bf16.mxu0 %v2138_v15  ;;  %v2153_v15 = vld [vmem:[%s2785_s1 + $0xf0] sm:$0xff]   ;;  %s2316_s12 = smov 4  }
  0x19   : > { %v221_v6 = vld [vmem:[%s219_s25] sm:$0xff]  ;;  %1941 = vmatpush3.bf16.msra.mxu1 %v2139_v34  ;;  %s2315_s25 = smov 32  }
  0x1a   : > { %v1741_v8 = vclamps-f32 %v221_v6, 1.0  ;;  %1942 = vmatprep.subr.bf16.mxu1 %v2141_v48  ;;  %v2148_v6 = vld [vmem:[%s2785_s1 + $0x28] sm:$0xff]   ;;  %v2162_v48 = vld [vmem:[%s2785_s1 + $0x100] sm:$0xff]  }
  0x1b   : > { %1921 = vmatpush3.bf16.msra.mxu0 %v2140_v39 }
  0x1c   : > { %v1742_v10 = vadd.f32 1.0, %v1741_v8  ;;  %1922 = vmatprep.subr.bf16.mxu0 %v2142_v50  ;;  %v2166_v50 = vld [vmem:[%s2785_s1 + $0x148] sm:$0xff]  }
  0x1d   : > { %1943 = vmatpush3.bf16.msra.mxu1 %v2143_v55  ;;  %v2317_v55 = vmov 0  }
  0x1e   : > { %v225_v13 = vmul.f32 4.5, %v1742_v10  ;;  %1944 = vmatprep.subr.bf16.mxu1 %v2145_v1  ;;  %v2149_v10 = vld [vmem:[%s2785_s1 + $0xe8] sm:$0xff]  }
  0x1f   : > { %1923 = vmatpush3.bf16.msra.mxu0 %v2144_v57  ;;  %v2169_v57 = vld [vmem:[%s2785_s1 + $0x1c8] sm:$0xff]  }
  0x20   : > { %v1743_v16 = vadd.f32 -1.0, %v225_v13  ;;  %v1747_v17 = vadd.f32 -3.0, %v225_v13  ;;  %v1745_v18 = vadd.f32 -2.0, %v225_v13  ;;  %v1751_v19 = vadd.f32 -5.0, %v225_v13  ;;  %1924 = vmatprep.subr.bf16.mxu0 %v2146_v3 }
  0x21   : > { %v1749_v20 = vadd.f32 -4.0, %v225_v13  ;;  %v1753_v21 = vadd.f32 -6.0, %v225_v13  ;;  %v1755_v22 = vadd.f32 -7.0, %v225_v13  ;;  %v1757_v23 = vadd.f32 -8.0, %v225_v13  ;;  %1945 = vmatpush3.bf16.msra.mxu1 %v2147_v4  ;;  %v2176_v4 = vld [vmem:[%s2785_s1 + $0x118] sm:$0xff]  }
  0x22   : > { %v233_v24 = vand.u32 2147483647, %v1743_v16  ;;  %v269_v25 = vand.u32 2147483647, %v1747_v17  ;;  %v251_v26 = vand.u32 2147483647, %v1745_v18  ;;  %1946 = vmatprep.subr.bf16.mxu1 %v2149_v10 }
  0x23   : > { %v300_v27 = vand.u32 2147483647, %v1751_v19  ;;  %v287_v28 = vand.u32 2147483647, %v1749_v20  ;;  %v318_v29 = vand.u32 2147483647, %v1753_v21  ;;  %1925 = vmatpush3.bf16.msra.mxu0 %v2148_v6 }
  0x24   : > { %v234_v30 = vsub.f32 1.0, %v233_v24  ;;  %v270_v31 = vsub.f32 1.0, %v269_v25  ;;  %v252_v32 = vsub.f32 1.0, %v251_v26  ;;  %v336_v33 = vand.u32 2147483647, %v1755_v22  ;;  %1926 = vmatprep.subr.bf16.mxu0 %v2150_v11  ;;  %v2154_v16 = vld [vmem:[%s2785_s1 + $0x78] sm:$0xff]  }
  0x25   : > { %v301_v35 = vsub.f32 1.0, %v300_v27  ;;  %v288_v36 = vsub.f32 1.0, %v287_v28  ;;  %v319_v37 = vsub.f32 1.0, %v318_v29  ;;  %v354_v38 = vand.u32 2147483647, %v1757_v23  ;;  %1947 = vmatpush3.bf16.msra.mxu1 %v2151_v12  ;;  %v2155_v17 = vld [vmem:[%s2785_s1 + $0xb0] sm:$0xff]  }
  0x26   : > { %v235_v40 = vmax.f32 %v234_v30, 0.0  ;;  %v271_v41 = vmax.f32 %v270_v31, 0.0  ;;  %v253_v42 = vmax.f32 %v252_v32, 0.0  ;;  %v337_v44 = vsub.f32 1.0, %v336_v33  ;;  %1948 = vmatprep.subr.bf16.mxu1 %v2153_v15  ;;  %v2156_v18 = vld [vmem:[%s2785_s1 + $0x38] sm:$0xff]   ;;  %v2161_v21 = vld [vmem:[%s2785_s1 + $0x140] sm:$0xff]  }
  0x27   : > { %v302_v43 = vmax.f32 %v301_v35, 0.0  ;;  %v289_v47 = vmax.f32 %v288_v36, 0.0  ;;  %v320_v49 = vmax.f32 %v319_v37, 0.0  ;;  %v355_v53 = vsub.f32 1.0, %v354_v38  ;;  %1927 = vmatpush3.bf16.msra.mxu0 %v2152_v14  ;;  %v2157_v19 = vld [vmem:[%s2785_s1 + $0xf8] sm:$0xff]   ;;  %v2165_v22 = vld [vmem:[%s2785_s1 + $0x1c0] sm:$0xff]  }
  0x28   : > { %v1900_v45 = vpack.c.bf16 %v235_v40, %v235_v40  ;;  %v1902_v46 = vpack.c.bf16 %v271_v41, %v271_v41  ;;  %v1901_v51 = vpack.c.bf16 %v253_v42, %v253_v42  ;;  %v1759_v54 = vadd.f32 -9.0, %v225_v13  ;;  %1928 = vmatprep.subr.bf16.mxu0 %v2154_v16  ;;  %v2160_v20 = vld [vmem:[%s2785_s1 + $0xb8] sm:$0xff]   ;;  %v2178_v6 = vld [vmem:[%s2785_s1 + $0x160] sm:$0xff]   ;;  %v2182_v10 = vld [vmem:[%s2785_s1 + $0x168] sm:$0xff]  }
  0x29   : > { %v1904_v52 = vpack.c.bf16 %v302_v43, %v302_v43  ;;  %v226_v56 = vand.u32 2147483647, %v225_v13  ;;  %v338_v59 = vmax.f32 %v337_v44, 0.0  ;;  %v1903_v61 = vpack.c.bf16 %v289_v47, %v289_v47  ;;  %1949 = vmatpush3.bf16.msra.mxu1 %v2155_v17  ;;  %v2183_v11 = vld [vmem:[%s2785_s1 + $0x1a0] sm:$0xff]   ;;  %v2184_v12 = vld [vmem:[%s2785_s1 + $0x128] sm:$0xff]   ;;  %v2186_v14 = vld [vmem:[%s2785_s1 + $0x170] sm:$0xff]  }
  0x2a   : > { %240 = vrot.lane.b32.xlu0 %v1900_v45, %s2308_s10  ;;  %276 = vrot.lane.b32.xlu1 %v1902_v46, %s2309_s11  ;;  %v372_v58 = vand.u32 2147483647, %v1759_v54  ;;  %v1905_v62 = vpack.c.bf16 %v320_v49, %v320_v49  ;;  %v356_v63 = vmax.f32 %v355_v53, 0.0  ;;  %s2312_s10 = smov 16   ;;  %s2313_s11 = smov 88   ;;  %v2167_v54 = vld [vmem:[%s2785_s1 + $0x180] sm:$0xff]  }
  0x2b   : > { %v227_v60 = vsub.f32 1.0, %v226_v56  ;;  %v1906_v7 = vpack.c.bf16 %v338_v59, %v338_v59  ;;  %1929 = vmatpush3.bf16.msra.mxu0 %v2156_v18  ;;  %1950 = vmatprep.subr.bf16.mxu1 %v2157_v19  ;;  %v2168_v56 = vld [vmem:[%s2785_s1 + $0x108] sm:$0xff]   ;;  %v2188_v16 = vld [vmem:[%s2785_s1 + $0x130] sm:$0xff]   ;;  %v2192_v18 = vld [vmem:[%s2785_s1 + $0x178] sm:$0xff]  }
  0x2c   : > { %v373_v0 = vsub.f32 1.0, %v372_v58  ;;  %v1907_v8 = vpack.c.bf16 %v356_v63, %v356_v63  ;;  %1958 = vmatprep.subr.bf16.mxu0 %v2161_v21  ;;  %v2170_v58 = vld [vmem:[%s2785_s1 + $0x150] sm:$0xff]   ;;  %v2171_v59 = vld [vmem:[%s2785_s1 + $0x188] sm:$0xff]   ;;  %v2197_v21 = vld [vmem:[%s2785_s1 + $0x1f8] sm:$0xff]  }
  0x2d   : > { %v228_v2 = vmax.f32 %v227_v60, 0.0  ;;  %1951 = vmatpush3.bf16.msra.mxu1 %v2160_v20  ;;  %v2187_v15 = vld [vmem:[%s2785_s1 + $0x1a8] sm:$0xff]   ;;  %v2191_v17 = vld [vmem:[%s2785_s1 + $0x1f0] sm:$0xff]   ;;  %v2194_v20 = vld [vmem:[%s2785_s1 + $0x138] sm:$0xff]  }
  0x2e   : > { %258 = vrot.lane.b32.xlu0 %v1901_v51, %s2310_s16  ;;  %307 = vrot.lane.b32.xlu1 %v1904_v52, %s2311_s17  ;;  %v374_v9 = vmax.f32 %v373_v0, 0.0  ;;  %v2174_v0 = vld [vmem:[%s2785_s1 + $0x158] sm:$0xff]   ;;  %v2193_v19 = vld [vmem:[%s2785_s1 + $0x1b0] sm:$0xff]   ;;  %s1663_s16 = scalar_lea.sflag [#allocation5], %s213_s8  ;;  %s2321_s17 = smov [#allocation4]  }
  0x2f   : > { %v229_v5 = vpack.c.bf16 %v228_v2, %v228_v2  ;;  %1980 = vmatprep.subr.bf16.mxu1 %v2165_v22  ;;  %v2175_v2 = vld [vmem:[%s2785_s1 + $0x190] sm:$0xff]   ;;  %v2198_v22 = vld [vmem:[%s2785_s1 + $0x1b8] sm:$0xff]  }
  0x30   : > { %v1908_v13 = vpack.c.bf16 %v374_v9, %v374_v9  ;;  %v2181_v9 = vld [vmem:[%s2785_s1 + $0x1e0] sm:$0xff]  }
  0x31   : > { %231 = vst.msk [vmem:[#allocation2] sm:$0xf] %vm230_vm0, %v229_v5  ;;  %vm332_vm0 = vcmask 490500   ;;  %v2177_v5 = vld [vmem:[%s2785_s1 + $0x1d8] sm:$0xff]  }
  0x32   : > { %294 = vrot.lane.b32.xlu0 %v1903_v61, %s2312_s10  ;;  %325 = vrot.lane.b32.xlu1 %v1905_v62, %s2313_s11  ;;  %vm333_vm5 = vmor %vm332_vm0, %vm331_vm15  ;;  %vm384_vm15 = vcmask 1044288   ;;  %v2172_v61 = vld [vmem:[%s2785_s1 + $0x110] sm:$0xff]   ;;  %vm1106_vm0 = vcmask 519168   ;;  %s1897_s10 = sshll.u32 %s2373_s22, 7  ;;  %s215_s11 = scalar_lea.vmem [#allocation4], %s1739_s9 }
  0x33   : > { %v2173_v62 = vld [vmem:[%s2785_s1 + $0x1d0] sm:$0xff]   ;;  %s2742_s15 = scalar_lea.hbm %s2789_s5, %s1897_s10 }
  0x36   : > { %343 = vrot.lane.b32.xlu0 %v1906_v7, %s2314_s23  ;;  %361 = vrot.lane.b32.xlu1 %v1907_v8, %s2315_s25  ;;  %v2179_v7 = vld [vmem:[%s2785_s1 + $0x198] sm:$0xff]   ;;  %v2180_v8 = vld [vmem:[%s2785_s1 + $0x120] sm:$0xff]   ;;  %s2248_s23 = sshll.u32 %s2321_s17, 4  ;;  %s2249_s23 = int_to_ptr.vmem [resolvable:$false] %s2248_s23 }
  0x37   : > { %s2250_s25 = scalar_lea.vmem %s2249_s23, 256 }
  0x3a   : > { %379 = vrot.lane.b32.xlu0 %v1908_v13, %s2316_s12  ;;  %v2185_v13 = vld [vmem:[%s2785_s1 + $0x1e8] sm:$0xff]   ;;  %s1676_s12 = sshll.u32 %s215_s11, 4  ;;  %s2744_s12 = int_to_ptr.vmem [resolvable:$true] %s1676_s12 }
  0x3b   : > { %s2244_s22 = scalar_lea.vmem %s2744_s12, 128  ;;  %p2251_p0 = scmp.lt.s32.totalorder %s2744_s12, %s2249_s23 }
  0x3c   : > { %p2245_p11 = scmp.ne.s32.totalorder %s2744_s12, %s2244_s22  ;;  %p2252_p1 = scmp.lt.s32.totalorder %s2250_s25, %s2244_s22 }
  0x3e   : > { %p2246_p12 = pnand %p2245_p11, %p2390_p5  ;;  %p2253_p2 = por %p2252_p1, %p2251_p0 }
  0x40   : > { %p2247_p13 = pneg %p2246_p12 }
  0x42   : > { %p2254_p3 = pnand %p2253_p2, %p2247_p13 }
  0x9c   : > { %v241_v23 = vpop.permute.xlu0 %240  ;;  %v277_v24 = vpop.permute.xlu1 %276 }
  0x9d   : > { %v242_v25 = vrot.slane %v241_v23, 4  ;;  %v278_v27 = vrot.slane %v277_v24, 4 }
  0x9f   : > { %v244_v26 = vsel %vm243_vm3, %v242_v25, %v241_v23  ;;  %v280_v33 = vsel %vm279_vm10, %v278_v27, %v277_v24  ;;  %vm315_vm3 = vmor %vm314_vm13, %vm313_vm12  ;;  %vm346_vm10 = vcmask 490496   ;;  %v2199_v25 = vld [vmem:[%s2787_s3 + $0x40] sm:$0xff]   ;;  %v2201_v27 = vld [vmem:[%s2787_s3 + $0x48] sm:$0xff]  }
  0xa0   : > { %249 = vst.msk [vmem:[#allocation2] sm:$0xff] %vm248_vm4, %v244_v26  ;;  %v259_v28 = vpop.permute.xlu0 %258  ;;  %v308_v29 = vpop.permute.xlu1 %307  ;;  %vm328_vm4 = vcmask 719872   ;;  %vm351_vm12 = vmor %vm350_vm7, %vm349_vm6  ;;  %v2200_v26 = vld [vmem:[%s2787_s3] sm:$0xff]  }
  0xa1   : > { %v260_v30 = vrot.slane %v259_v28, 4  ;;  %v309_v31 = vrot.slane %v308_v29, 4 }
  0xa3   : > { %v262_v32 = vsel %vm261_vm9, %v260_v30, %v259_v28  ;;  %v311_v37 = vsel %vm310_vm1, %v309_v31, %v308_v29  ;;  %vm368_vm9 = vcmask 31748   ;;  %v2203_v28 = vld [vmem:[%s2787_s3 + $0xc0] sm:$0xff]   ;;  %v2207_v30 = vld [vmem:[%s2787_s3 + $0xc8] sm:$0xff]   ;;  %vm1119_vm1 = vcmask 1043968  }
  0xa4   : > { %267 = vst.msk [vmem:[#allocation2 + $0x4] sm:$0xff] %vm266_vm11, %v262_v32  ;;  %v295_v34 = vpop.permute.xlu0 %294  ;;  %v326_v35 = vpop.permute.xlu1 %325  ;;  %vm364_vm11 = vcmask 261120   ;;  %vm369_vm13 = vmor %vm368_vm9, %vm367_vm8  ;;  %v2204_v29 = vld [vmem:[%s2787_s3 + $0x80] sm:$0xff]   ;;  %v2202_v31 = vld [vmem:[%s2787_s3 + $0x8] sm:$0xff]  }
  0xa5   : > { %285 = vst.msk [vmem:[#allocation2 + $0x8] sm:$0xff] %vm284_vm14, %v280_v33  ;;  %v327_v36 = vrot.slane %v326_v35, 4  ;;  %vm382_vm14 = vcmask 846880   ;;  %v2205_v32 = vld [vmem:[%s2787_s3 + $0x50] sm:$0xff]   ;;  %v2208_v33 = vld [vmem:[%s2787_s3 + $0x88] sm:$0xff]  }
  0xa6   : > { %298 = vst.msk [vmem:[#allocation2 + $0xc] sm:$0xf] %vm297_vm2, %v295_v34  ;;  %v2211_v34 = vld [vmem:[%s2787_s3 + $0xd0] sm:$0xff]   ;;  %vm2320_vm2 = vmmov 0  }
  0xa7   : > { %316 = vst.msk [vmem:[#allocation2 + $0xc] sm:$0xff] %vm315_vm3, %v311_v37  ;;  %v329_v38 = vsel %vm328_vm4, %v327_v36, %v326_v35  ;;  %v2206_v35 = vld [vmem:[%s2787_s3 + $0x10] sm:$0xff]   ;;  %v2209_v36 = vld [vmem:[%s2787_s3 + $0x58] sm:$0xff]  }
  0xa8   : > { %334 = vst.msk [vmem:[#allocation2 + $0x10] sm:$0xff] %vm333_vm5, %v329_v38  ;;  %v344_v39 = vpop.permute.xlu0 %343  ;;  %v362_v40 = vpop.permute.xlu1 %361  ;;  %v2212_v37 = vld [vmem:[%s2787_s3 + $0x90] sm:$0xff]   ;;  %v2215_v38 = vld [vmem:[%s2787_s3 + $0xd8] sm:$0xff]  }
  0xa9   : > { %v345_v41 = vrot.slane %v344_v39, 4  ;;  %v363_v42 = vrot.slane %v362_v40, 4 }
  0xab   : > { %v386_v43 = vld [vmem:[#allocation2] sm:$0xff]  ;;  %v347_v44 = vsel %vm346_vm10, %v345_v41, %v344_v39  ;;  %v365_v45 = vsel %vm364_vm11, %v363_v42, %v362_v40  ;;  %v2210_v39 = vld [vmem:[%s2787_s3 + $0x18] sm:$0xff]  }
  0xac   : > { %v1762_v46 = vcombine.low %v386_v43, %v386_v43  ;;  %v1763_v47 = vcombine.high %v386_v43, %v386_v43  ;;  %352 = vst.msk [vmem:[#allocation2 + $0x14] sm:$0xff] %vm351_vm12, %v347_v44  ;;  %v380_v49 = vpop.permute.xlu0 %379  ;;  %v2213_v40 = vld [vmem:[%s2787_s3 + $0x60] sm:$0xff]   ;;  %v2216_v41 = vld [vmem:[%s2787_s3 + $0x98] sm:$0xff]   ;;  %v2217_v44 = vld [vmem:[%s2787_s3 + $0x68] sm:$0xff]  }
  0xad   : > { %370 = vst.msk [vmem:[#allocation2 + $0x18] sm:$0xff] %vm369_vm13, %v365_v45  ;;  %v2219_v42 = vld [vmem:[%s2787_s3 + $0xe0] sm:$0xff]   ;;  %v2218_v45 = vld [vmem:[%s2787_s3 + $0x28] sm:$0xff]  }
  0xae   : > { %969 = vmatprep.mubr.bf16.mxu0 %v1763_v47  ;;  %v387_v51 = vld [vmem:[#allocation2 + $0x8] sm:$0xff]  ;;  %383 = vst.msk [vmem:[#allocation2 + $0x1c] sm:$0xf] %vm382_vm14, %v380_v49  ;;  %v2214_v43 = vld [vmem:[%s2787_s3 + $0x20] sm:$0xff]  }
  0xaf   : > { %970 = vmatmul.mubr.bf16.vlgmr.msra.gmra.mrb[0].mxu0 %v1762_v46  ;;  %v1764_v52 = vcombine.low %v387_v51, %v387_v51  ;;  %v1765_v53 = vcombine.high %v387_v51, %v387_v51  ;;  %385 = vst.msk [vmem:[#allocation2 + $0x1c] sm:$0xf] %vm384_vm15, %v2317_v55  ;;  %v1761_v47 = vld [vmem:[%s2786_s2] ss:$0 sm:$0xff] }
  0xb0   : > { %1959 = vmatpush3.bf16.msra.mxu0 %v2162_v48 }
  0xb1   : > { %1009 = vmatprep.mubr.bf16.mxu1 %v1765_v53  ;;  %1960 = vmatprep.subr.bf16.mxu0 %v2166_v50 }
  0xb2   : > { %1010 = vmatmul.mubr.bf16.vlgmr.msra.gmra.mrb[0].mxu1 %v1764_v52 }
  0xb3   : > { %1981 = vmatpush3.bf16.msra.mxu1 %v2167_v54  ;;  %v388_v60 = vld [vmem:[#allocation2 + $0x10] sm:$0xff] }
  0xb4   : > { %1961 = vmatpush3.bf16.msra.mxu0 %v2168_v56  ;;  %1982 = vmatprep.subr.bf16.mxu1 %v2169_v57  ;;  %v1767_v63 = vcombine.high %v388_v60, %v388_v60  ;;  %v1766_v23 = vcombine.low %v388_v60, %v388_v60 }
  0xb5   : > { %1962 = vmatprep.subr.bf16.mxu0 %v2170_v58 }
  0xb6   : > { %1049 = vmatprep.mubr.bf16.mxu0 %v1767_v63  ;;  %v389_v1 = vld [vmem:[#allocation2 + $0x18] sm:$0xff] }
  0xb7   : > { %1983 = vmatpush3.bf16.msra.mxu1 %v2171_v59  ;;  %v1769_v3 = vcombine.high %v389_v1, %v389_v1  ;;  %v1768_v24 = vcombine.low %v389_v1, %v389_v1 }
  0xb8   : > { %1963 = vmatpush3.bf16.msra.mxu0 %v2172_v61  ;;  %1984 = vmatprep.subr.bf16.mxu1 %v2173_v62 }
  0xb9   : > { %1964 = vmatprep.subr.bf16.mxu0 %v2174_v0  ;;  %1089 = vmatprep.mubr.bf16.mxu1 %v1769_v3 }
  0xbb   : > { %1985 = vmatpush3.bf16.msra.mxu1 %v2175_v2 }
  0xbc   : > { %1965 = vmatpush3.bf16.msra.mxu0 %v2176_v4  ;;  %1986 = vmatprep.subr.bf16.mxu1 %v2177_v5 }
  0xbd   : > { %1966 = vmatprep.subr.bf16.mxu0 %v2178_v6 }
  0xbf   : > { %1987 = vmatpush3.bf16.msra.mxu1 %v2179_v7 }
  0xc0   : > { %1967 = vmatpush3.bf16.msra.mxu0 %v2180_v8  ;;  %1988 = vmatprep.subr.bf16.mxu1 %v2181_v9 }
  0xc1   : > { %1968 = vmatprep.subr.bf16.mxu0 %v2182_v10  ;;  %v2220_v10 = vld [vmem:[%s2787_s3 + $0xa0] sm:$0xff]  }
  0xc3   : > { %1989 = vmatpush3.bf16.msra.mxu1 %v2183_v11  ;;  %v2221_v11 = vld [vmem:[%s2787_s3 + $0x70] sm:$0xff]  }
  0xc4   : > { %1969 = vmatpush3.bf16.msra.mxu0 %v2184_v12  ;;  %1990 = vmatprep.subr.bf16.mxu1 %v2185_v13  ;;  %v2222_v12 = vld [vmem:[%s2787_s3 + $0x30] sm:$0xff]  }
  0xc5   : > { %1970 = vmatprep.subr.bf16.mxu0 %v2186_v14  ;;  %v2223_v14 = vld [vmem:[%s2787_s3 + $0xe8] sm:$0xff]  }
  0xc7   : > { %1991 = vmatpush3.bf16.msra.mxu1 %v2187_v15 }
  0xc8   : > { %1971 = vmatpush3.bf16.msra.mxu0 %v2188_v16  ;;  %1992 = vmatprep.subr.bf16.mxu1 %v2191_v17 }
  0xc9   : > { %1972 = vmatprep.subr.bf16.mxu0 %v2192_v18 }
  0xcb   : > { %1993 = vmatpush3.bf16.msra.mxu1 %v2193_v19 }
  0xcc   : > { %1973 = vmatpush3.bf16.msra.mxu0 %v2194_v20  ;;  %1994 = vmatprep.subr.bf16.mxu1 %v2197_v21 }
  0xcd   : > { %2002 = vmatprep.subr.bf16.mxu0 %v2199_v25 }
  0xcf   : > { %1050 = vmatmul.mubr.bf16.vlgmr.msra.gmra.mrb[4].mxu0 %v1766_v23  ;;  %1995 = vmatpush3.bf16.msra.mxu1 %v2198_v22  ;;  %v2224_v23 = vld [vmem:[%s2787_s3 + $0xa8] sm:$0xff]  }
  0xd0   : > { %2003 = vmatpush3.bf16.msra.mxu0 %v2200_v26  ;;  %2024 = vmatprep.subr.bf16.mxu1 %v2203_v28 }
  0xd1   : > { %2004 = vmatprep.subr.bf16.mxu0 %v2201_v27 }
  0xd2   : > { %1090 = vmatmul.mubr.bf16.vlgmr.msra.gmra.mrb[4].mxu1 %v1768_v24 }
  0xd3   : > { %2025 = vmatpush3.bf16.msra.mxu1 %v2204_v29 }
  0xd4   : > { %2026 = vmatprep.subr.bf16.mxu1 %v2207_v30  ;;  %2005 = vmatpush3.bf16.msra.mxu0 %v2202_v31 }
  0xd5   : > { %2006 = vmatprep.subr.bf16.mxu0 %v2205_v32 }
  0xd7   : > { %2027 = vmatpush3.bf16.msra.mxu1 %v2208_v33 }
  0xd8   : > { %2028 = vmatprep.subr.bf16.mxu1 %v2211_v34  ;;  %2007 = vmatpush3.bf16.msra.mxu0 %v2206_v35  ;;  %v2225_v34 = vld [vmem:[%s2787_s3 + $0x78] sm:$0xff]  }
  0xd9   : > { %2008 = vmatprep.subr.bf16.mxu0 %v2209_v36  ;;  %v2226_v35 = vld [vmem:[%s2787_s3 + $0x38] sm:$0xff]  }
  0xdb   : > { %2029 = vmatpush3.bf16.msra.mxu1 %v2212_v37 }
  0xdc   : > { %2030 = vmatprep.subr.bf16.mxu1 %v2215_v38  ;;  %2009 = vmatpush3.bf16.msra.mxu0 %v2210_v39  ;;  %v2227_v39 = vld [vmem:[%s2787_s3 + $0xf0] sm:$0xff]  }
  0xdd   : > { %2010 = vmatprep.subr.bf16.mxu0 %v2213_v40 }
  0xdf   : > { %2031 = vmatpush3.bf16.msra.mxu1 %v2216_v41 }
  0xe0   : > { %2032 = vmatprep.subr.bf16.mxu1 %v2219_v42  ;;  %2011 = vmatpush3.bf16.msra.mxu0 %v2214_v43  ;;  %v2228_v43 = vld [vmem:[%s2787_s3 + $0xb0] sm:$0xff]  }
  0xe1   : > { %2012 = vmatprep.subr.bf16.mxu0 %v2217_v44 }
  0xe3   : > { %2033 = vmatpush3.bf16.msra.mxu1 %v2220_v10 }
  0xe4   : > { %2013 = vmatpush3.bf16.msra.mxu0 %v2218_v45  ;;  %2034 = vmatprep.subr.bf16.mxu1 %v2223_v14 }
  0xe5   : > { %2014 = vmatprep.subr.bf16.mxu0 %v2221_v11 }
  0xe7   : > { %2035 = vmatpush3.bf16.msra.mxu1 %v2224_v23  ;;  %v2239_v23 = vld [vmem:[%s2787_s3 + $0x120] sm:$0xff]  }
  0xe8   : > { %2015 = vmatpush3.bf16.msra.mxu0 %v2222_v12  ;;  %2036 = vmatprep.subr.bf16.mxu1 %v2227_v39 }
  0xe9   : > { %2016 = vmatprep.subr.bf16.mxu0 %v2225_v34 }
  0xeb   : > { %2037 = vmatpush3.bf16.msra.mxu1 %v2228_v43 }
  0xec   : > { %2017 = vmatpush3.bf16.msra.mxu0 %v2226_v35 }
 0x182   : > { %v1930_v46 = vpop.f32.mrb[0].mxu0 }
 0x183   : > { %v1931_v48 = vpop.f32.mrb[1].mxu0 }
 0x184   : > { %v1932_v49 = vadd.f32 %v1931_v48, %v1930_v46  ;;  %v1933_v50 = vpop.f32.mrb[2].mxu0 }
 0x185   : > { %v1934_v51 = vpop.f32.mrb[3].mxu0  ;;  %v1952_v52 = vpop.f32.mrb[0].mxu1 }
 0x186   : > { %v972_v53 = vadd.f32 %v1932_v49, %v1761_v47  ;;  %v1953_v54 = vpop.f32.mrb[1].mxu1 }
 0x187   : > { %v1954_v55 = vadd.f32 %v1953_v54, %v1952_v52  ;;  %v1955_v56 = vpop.f32.mrb[2].mxu1  ;;  %v2231_v52 = vld [vmem:[%s2787_s3 + $0xf8] sm:$0xff]  }
 0x188   : > { %v1956_v57 = vpop.f32.mrb[3].mxu1  ;;  %2038 = vmatprep.subr.bf16.mxu1 %v2231_v52 }
 0x189   : > { %v1012_v58 = vadd.f32 %v1954_v55, %v972_v53  ;;  %v2233_v55 = vld [vmem:[%s2787_s3 + $0xb8] sm:$0xff]  }
 0x18a   : > { %2039 = vmatpush3.bf16.msra.mxu1 %v2233_v55 }
 0x1a2   : > { %v1974_v59 = vpop.f32.mrb[4].mxu0 }
 0x1a3   : > { %v1975_v60 = vpop.f32.mrb[5].mxu0 }
 0x1a4   : > { %v1976_v61 = vadd.f32 %v1975_v60, %v1974_v59  ;;  %v1977_v62 = vpop.f32.mrb[6].mxu0  ;;  %v2319_v60 = vmov 0.0  }
 0x1a5   : > { %v1978_v63 = vpop.f32.mrb[7].mxu0  ;;  %v1996_v0 = vpop.f32.mrb[4].mxu1  ;;  %2055 = vmatprep.subr.bf16.mxu0 %v2319_v60 }
 0x1a6   : > { %v1052_v1 = vadd.f32 %v1976_v61, %v1012_v58  ;;  %v1997_v2 = vpop.f32.mrb[5].mxu1 }
 0x1a7   : > { %v1998_v3 = vadd.f32 %v1997_v2, %v1996_v0  ;;  %v1999_v4 = vpop.f32.mrb[6].mxu1 }
 0x1a8   : > { %v2000_v5 = vpop.f32.mrb[7].mxu1 }
 0x1a9   : > { %v1092_v6 = vadd.f32 %v1998_v3, %v1052_v1 }
 0x1ab   : > { %v1097_v7 = vmax.f32 %v1092_v6, 0.0 }
 0x1ad   : > { %v1834_v8 = vclamps-f32 %v1097_v7, 1.0 }
 0x1af   : > { %v1835_v9 = vadd.f32 1.0, %v1834_v8 }
 0x1b1   : > { %v1101_v13 = vmul.f32 4.5, %v1835_v9 }
 0x1b3   : > { %v1839_v15 = vadd.f32 -3.0, %v1101_v13  ;;  %v1836_v16 = vadd.f32 -1.0, %v1101_v13  ;;  %v1845_v17 = vadd.f32 -7.0, %v1101_v13  ;;  %v1842_v18 = vadd.f32 -5.0, %v1101_v13 }
 0x1b4   : > { %v1848_v19 = vadd.f32 -9.0, %v1101_v13  ;;  %v1838_v20 = vadd.f32 -2.0, %v1101_v13  ;;  %v1102_v21 = vand.u32 2147483647, %v1101_v13  ;;  %v1844_v22 = vadd.f32 -6.0, %v1101_v13 }
 0x1b5   : > { %v1128_v24 = vand.u32 2147483647, %v1839_v15  ;;  %v1109_v25 = vand.u32 2147483647, %v1836_v16  ;;  %v1164_v26 = vand.u32 2147483647, %v1845_v17 }
 0x1b6   : > { %v1146_v27 = vand.u32 2147483647, %v1842_v18  ;;  %v1182_v28 = vand.u32 2147483647, %v1848_v19  ;;  %v1122_v29 = vand.u32 2147483647, %v1838_v20 }
 0x1b7   : > { %v1129_v30 = vsub.f32 1.0, %v1128_v24  ;;  %v1110_v31 = vsub.f32 1.0, %v1109_v25  ;;  %v1165_v32 = vsub.f32 1.0, %v1164_v26  ;;  %v1103_v33 = vsub.f32 1.0, %v1102_v21  ;;  %v2232_v16 = vld [vmem:[%s2787_s3 + $0x100] sm:$0xff]   ;;  %v2236_v20 = vld [vmem:[%s2787_s3 + $0x108] sm:$0xff]  }
 0x1b8   : > { %v1147_v36 = vsub.f32 1.0, %v1146_v27  ;;  %v1123_v37 = vsub.f32 1.0, %v1122_v29  ;;  %v1158_v38 = vand.u32 2147483647, %v1844_v22  ;;  %v1183_v45 = vsub.f32 1.0, %v1182_v28  ;;  %v2237_v21 = vld [vmem:[%s2787_s3 + $0x110] sm:$0xff]  }
 0x1b9   : > { %v1130_v40 = vmax.f32 %v1129_v30, 0.0  ;;  %v1111_v41 = vmax.f32 %v1110_v31, 0.0  ;;  %v1104_v42 = vmax.f32 %v1103_v33, 0.0  ;;  %v1166_v44 = vmax.f32 %v1165_v32, 0.0  ;;  %v2238_v22 = vld [vmem:[%s2787_s3 + $0x118] sm:$0xff]   ;;  %v2240_v24 = vld [vmem:[%s2787_s3 + $0x128] sm:$0xff]  }
 0x1ba   : > { %v1124_v46 = vmax.f32 %v1123_v37, 0.0  ;;  %v1159_v47 = vsub.f32 1.0, %v1158_v38  ;;  %v1148_v50 = vmax.f32 %v1147_v36, 0.0  ;;  %v1841_v56 = vadd.f32 -4.0, %v1101_v13  ;;  %v2241_v25 = vld [vmem:[%s2787_s3 + $0x130] sm:$0xff]   ;;  %v2242_v26 = vld [vmem:[%s2787_s3 + $0x138] sm:$0xff]  }
 0x1bb   : > { %v1910_v48 = vpack.c.bf16 %v1130_v40, %v1130_v40  ;;  %v1909_v49 = vpack.c.bf16 %v1111_v41, %v1111_v41  ;;  %v1105_v51 = vpack.c.bf16 %v1104_v42, %v1104_v42  ;;  %v1847_v57 = vadd.f32 -8.0, %v1101_v13  ;;  %v1850_v32 = vld [vmem:[%s2788_s4] ss:$0 sm:$0xff] }
 0x1bc   : > { %v1125_v53 = vpack.c.bf16 %v1124_v46, %v1124_v46  ;;  %v1160_v54 = vmax.f32 %v1159_v47, 0.0  ;;  %v1184_v58 = vmax.f32 %v1183_v45, 0.0  ;;  %v1912_v61 = vpack.c.bf16 %v1166_v44, %v1166_v44 }
 0x1bd   : > { %1135 = vrot.lane.b32.xlu0 %v1910_v48, %s2318_s30  ;;  %1116 = vrot.lane.b32.xlu1 %v1909_v49, %s2318_s30  ;;  %1107 = vst.msk [vmem:[#allocation3] sm:$0xf] %vm1106_vm0, %v1105_v51  ;;  %v1911_v62 = vpack.c.bf16 %v1148_v50, %v1148_v50  ;;  %v1140_v63 = vand.u32 2147483647, %v1841_v56  ;;  %v1176_v0 = vand.u32 2147483647, %v1847_v57 }
 0x1be   : > { %1126 = vst.msk [vmem:[#allocation3 + $0x4] sm:$0xf] %vm1106_vm0, %v1125_v53  ;;  %v1161_v59 = vpack.c.bf16 %v1160_v54, %v1160_v54  ;;  %v1913_v3 = vpack.c.bf16 %v1184_v58, %v1184_v58 }
 0x1bf   : > { %v1141_v1 = vsub.f32 1.0, %v1140_v63  ;;  %v1177_v2 = vsub.f32 1.0, %v1176_v0 }
 0x1c0   : > { %1162 = vst.msk [vmem:[#allocation3 + $0xc] sm:$0xf] %vm1106_vm0, %v1161_v59 }
 0x1c1   : > { %1171 = vrot.lane.b32.xlu0 %v1912_v61, %s2318_s30  ;;  %1153 = vrot.lane.b32.xlu1 %v1911_v62, %s2318_s30  ;;  %v1142_v4 = vmax.f32 %v1141_v1, 0.0  ;;  %v1178_v5 = vmax.f32 %v1177_v2, 0.0 }
 0x1c3   : > { %v1143_v6 = vpack.c.bf16 %v1142_v4, %v1142_v4  ;;  %v1179_v7 = vpack.c.bf16 %v1178_v5, %v1178_v5 }
 0x1c5   : > { %1189 = vrot.lane.b32.xlu1 %v1913_v3, %s2318_s30  ;;  %1144 = vst.msk [vmem:[#allocation3 + $0x8] sm:$0xf] %vm1106_vm0, %v1143_v6  ;;  %1180 = vst.msk [vmem:[#allocation3 + $0x10] sm:$0xf] %vm1106_vm0, %v1179_v7 }
 0x22f   : > { %v1136_v8 = vpop.permute.xlu0 %1135  ;;  %v1117_v9 = vpop.permute.xlu1 %1116 }
 0x230   : > { %1138 = vst.msk [vmem:[#allocation3 + $0x4] sm:$0xf] %vm1119_vm1, %v1136_v8  ;;  %1120 = vst.msk [vmem:[#allocation3] sm:$0xf] %vm1119_vm1, %v1117_v9 }
 0x233   : > { %v1172_v10 = vpop.permute.xlu0 %1171  ;;  %v1154_v11 = vpop.permute.xlu1 %1153 }
 0x234   : > { %1174 = vst.msk [vmem:[#allocation3 + $0xc] sm:$0xf] %vm1119_vm1, %v1172_v10  ;;  %1156 = vst.msk [vmem:[#allocation3 + $0x8] sm:$0xf] %vm1119_vm1, %v1154_v11 }
 0x237   : > { %v1190_v12 = vpop.permute.xlu1 %1189  ;;  %v1193_v13 = vld [vmem:[#allocation3] sm:$0xff] }
 0x238   : > { %1192 = vst.msk [vmem:[#allocation3 + $0x10] sm:$0xf] %vm1119_vm1, %v1190_v12  ;;  %v1851_v14 = vcombine.low %v1193_v13, %v1193_v13  ;;  %v1852_v15 = vcombine.high %v1193_v13, %v1193_v13 }
 0x23a   : > { %1573 = vmatprep.mubr.bf16.mxu0 %v1852_v15 }
 0x23b   : > { %1574 = vmatmul.mubr.bf16.vlgmr.msra.gmra.mrb[8].mxu0 %v1851_v14  ;;  %v1194_v17 = vld [vmem:[#allocation3 + $0x8] sm:$0xff] }
 0x23c   : > { %2056 = vmatpush3.bf16.msra.mxu0 %v2232_v16  ;;  %v1853_v18 = vcombine.low %v1194_v17, %v1194_v17  ;;  %v1854_v19 = vcombine.high %v1194_v17, %v1194_v17  ;;  %2071 = vmatprep.mubr.msk.bf16.mxu0 %vm2320_vm2, %v2319_v60 }
 0x23d   : > { %2057 = vmatprep.subr.bf16.mxu0 %v2319_v60 }
 0x23e   : > { %1613 = vmatprep.mubr.bf16.mxu1 %v1854_v19 }
 0x23f   : > { %1614 = vmatmul.mubr.bf16.vlgmr.msra.gmra.mrb[8].mxu1 %v1853_v18  ;;  %v2243_v27 = vld [vmem:[#allocation3 + $0x10] ss:$0 sps:$4 sm:$0xff]  }
 0x240   : > { %2058 = vmatpush3.bf16.msra.mxu0 %v2236_v20 }
 0x241   : > { %2059 = vmatprep.subr.bf16.mxu0 %v2319_v60 }
 0x244   : > { %2060 = vmatpush3.bf16.msra.mxu0 %v2237_v21 }
 0x245   : > { %2061 = vmatprep.subr.bf16.mxu0 %v2319_v60 }
 0x248   : > { %2062 = vmatpush3.bf16.msra.mxu0 %v2238_v22 }
 0x249   : > { %2063 = vmatprep.subr.bf16.mxu0 %v2319_v60 }
 0x24c   : > { %2064 = vmatpush3.bf16.msra.mxu0 %v2239_v23 }
 0x24d   : > { %2065 = vmatprep.subr.bf16.mxu0 %v2319_v60 }
 0x250   : > { %2066 = vmatpush3.bf16.msra.mxu0 %v2240_v24 }
 0x251   : > { %2067 = vmatprep.subr.bf16.mxu0 %v2319_v60 }
 0x254   : > { %2068 = vmatpush3.bf16.msra.mxu0 %v2241_v25 }
 0x255   : > { %2069 = vmatprep.subr.bf16.mxu0 %v2319_v60 }
 0x258   : > { %2070 = vmatpush3.bf16.msra.mxu0 %v2242_v26 }
 0x25b   : > { %2072 = vmatmul.mubr.bf16.vlgmr.msra.gmra.mrb[12].mxu0 %v2243_v27 }
 0x30e   : > { %v2018_v28 = vpop.f32.mrb[8].mxu0 }
 0x30f   : > { %v2019_v29 = vpop.f32.mrb[9].mxu0 }
 0x310   : > { %v2020_v30 = vadd.f32 %v2019_v29, %v2018_v28  ;;  %v2021_v31 = vpop.f32.mrb[10].mxu0 }
 0x311   : > { %v2022_v33 = vpop.f32.mrb[11].mxu0 }
 0x312   : > { %v2040_v34 = vpop.f32.mrb[8].mxu1  ;;  %v1576_v36 = vadd.f32 %v2020_v30, %v1850_v32 }
 0x313   : > { %v2041_v35 = vpop.f32.mrb[9].mxu1 }
 0x314   : > { %v2042_v37 = vadd.f32 %v2041_v35, %v2040_v34  ;;  %v2043_v38 = vpop.f32.mrb[10].mxu1 }
 0x315   : > { %v2044_v39 = vpop.f32.mrb[11].mxu1 }
 0x316   : > { %v1616_v40 = vadd.f32 %v2042_v37, %v1576_v36 }
 0x32e   : > { %v1655_v41 = vpop.f32.mrb[12].mxu0 }
 0x32f   : > { %v1656_v42 = vadd.f32 %v1655_v41, %v1616_v40  ;;  %v2073_v43 = vpop.f32.mrb[13].mxu0 }
 0x330   : > { %v1658_v44 = vpop.f32.mrb[14].mxu0 }
 0x331   : > { %1661 = vst [vmem:[%s215_s11] sm:$0xff] %v1656_v42  ;;  %v2074_v45 = vpop.f32.mrb[15].mxu0 }
 0x332   : > { %2257 = shalt.err (!%p2254_p3)
}
 0x333   : > { %s2258_s26 = scalar_lea.hbm %s2742_s15, 128  ;;  %s2262_s7 = scalar_lea.hbm %s2789_s5, 256 }
 0x334   : > { %p2259_p4 = scmp.ne.s32.totalorder %s2742_s15, %s2258_s26  ;;  %p2263_p9 = scmp.lt.u32.totalorder %s2742_s15, %s2789_s5 }
 0x335   : > { %p2264_p10 = scmp.lt.u32.totalorder %s2262_s7, %s2258_s26  ;;  %p2266_p12 = scmp.lt.u32.totalorder %s2258_s26, %s2742_s15 }
 0x336   : > { %p2260_p7 = pnand %p2259_p4, %p2390_p5 }
 0x337   : > { %p2265_p11 = por %p2264_p10, %p2263_p9 }
 0x338   : > { %p2261_p8 = pneg %p2260_p7 }
 0x339   : > { %p2267_p13 = por %p2266_p12, %p2265_p11 }
 0x33b   : > { %p2268_p0 = pnand %p2267_p13, %p2261_p8 }
 0x33d   : > { %2271 = shalt.err (!%p2268_p0)
}
 0x33e   : > { %2075 = dma.vmem_to_hbm [thread:$0]  (%p2390_p5), %s2744_s12, 128, %s2742_s15, %s1663_s16  }
 0x33f PF: > { %p2081_p1 = scmp.ge.s32.totalorder %s2306_s21, 2  ;;  %s1688_s10 = sand.u32 1, %s2294_s18  }
 0x340   : > { %s1689_s11 = scalar_lea.sflag [#allocation5], %s1688_s10 }
 0x341   : > { %p2078_p2 = pnand %p2081_p1, %p2394_p6 }
 0x343   : > { %2289 = dma.done.wait (!%p2078_p2), %s1689_s11, 128  }
 0x344   : > { %2291 = vsyncadd (!%p2078_p2), %s1689_s11, 4294967168  ;;  %p15_p3 = scmp.ge.s32.totalorder %s2377_s24, 4   ;;  %s2792_s18 = smov %s2298_s19 }
 0x345   : > { %s2793_s19 = smov %s2302_s20  ;;  %s2794_s20 = smov %s2388_s27 }
 0x346   : > { %s2795_s21 = smov %s2377_s24  ;;  %17 = sbr.rel (!%p15_p3) target bundleno = 3 (0x3), region = 75 }
 0x34d   :  { %1694 = vsyncpa [#allocation5], 1 }
 0x34e   :  { %1696 = vsyncpa [#allocation5 + $0x1], 1 }

</bundles_post_ra>
